<compile_context>
chip_gen: v7x
topology: tpu7x:2x2x1
jax: 0.10.0
libtpu: 0.0.40
codegen_flags: <defaults>
</compile_context>

<pallas_src>
import functools

import jax
import jax.numpy as jnp
from jax.experimental import pallas as pl
from jax.experimental.pallas import tpu as pltpu


def _round_up(x, m):
    return ((x + m - 1) // m) * m


# (ctx index, par index, target-is-one).  Reference row order is
# [c1p1, c2p2, c1p2, c2p1] with targets [1, 1, 0, 0]; summation order does not
# matter for the mean loss / accuracy.  Order below lets consecutive pairings
# share one freshly loaded staged operand.
_PAIRINGS = ((0, 0, True), (0, 1, False), (1, 1, True), (1, 0, False))


def _loss_style_kernel(c1_ref, c2_ref, p1_ref, p2_ref,
                       w1c_ref, w1p_ref, b1_ref, gamma_ref, beta_ref,
                       w2_ref, b2_ref,
                       out_ref,
                       hc_ref, hq_ref, sum_ref, sqsum_ref,
                       *, tb, batch, hidp, resident, inv_n, eps):
    pass_idx = pl.program_id(0)   # 0: batch-stats pass, 1: normalize + loss pass
    tile_idx = pl.program_id(1)

    need_mask = (batch % tb) != 0

    # Row window of the current batch tile.  In resident mode the whole padded
    # batch sits in VMEM and is sliced here; in streaming mode the BlockSpec
    # already delivered exactly this tile (offset 0).
    row0 = pl.multiple_of(tile_idx * tb, tb) if resident else 0

    def tile(ref):
        return ref[pl.ds(row0, tb), :].astype(jnp.bfloat16)

    # ---- Linear-1, staged in VMEM scratch so at most ~2 (tb, hidp) f32 tiles
    # are ever live in vregs.  b1 is folded into the ctx halves once.
    b1 = b1_ref[...]
    hc_ref[0] = jnp.dot(tile(c1_ref), w1c_ref[...],
                        preferred_element_type=jnp.float32) + b1
    hc_ref[1] = jnp.dot(tile(c2_ref), w1c_ref[...],
                        preferred_element_type=jnp.float32) + b1
    hq_ref[0] = jnp.dot(tile(p1_ref), w1p_ref[...],
                        preferred_element_type=jnp.float32)
    hq_ref[1] = jnp.dot(tile(p2_ref), w1p_ref[...],
                        preferred_element_type=jnp.float32)

    if need_mask:
        rows = tile_idx * tb + jax.lax.broadcasted_iota(jnp.int32, (tb, 1), 0)
        valid = rows < batch           # padded rows contribute nothing
    else:
        valid = None

    @pl.when(pass_idx == 0)
    def _pass0():
        @pl.when(tile_idx == 0)
        def _init():
            sum_ref[...] = jnp.zeros_like(sum_ref)
            sqsum_ref[...] = jnp.zeros_like(sqsum_ref)

        # Per-feature batch statistics.  ReLU6 bounds h to [0, 6] so raw
        # sum / sum-of-squares accumulation is numerically safe here.
        # TODO(synk): switch to mean-shifted / Welford accumulation if the
        # effective batch (4*B) grows beyond ~1e5.
        ps = jnp.zeros((8, hidp), jnp.float32)
        pq = jnp.zeros((8, hidp), jnp.float32)
        for ci, pi, _ in _PAIRINGS:
            h = jnp.clip(hc_ref[ci] + hq_ref[pi], 0.0, 6.0)
            if valid is not None:
                h = jnp.where(valid, h, 0.0)
            # Reduce (tb, hidp) -> (8, hidp) with pure VPU adds (no XLU); the
            # final cross-sublane fold happens once in pass 1.
            for g in range(tb // 8):
                hg = h[g * 8:(g + 1) * 8, :]
                ps = ps + hg
                pq = pq + hg * hg
        sum_ref[...] += ps
        sqsum_ref[...] += pq

    @pl.when(pass_idx == 1)
    def _pass1():
        @pl.when(tile_idx == 0)
        def _init():
            out_ref[...] = jnp.zeros_like(out_ref)

        # Fold BN (training-mode stats, biased variance, eps=1e-5) and Linear-2
        # into a per-feature scale w2s and a scalar shift c.  O(hidp) work.
        mean = jnp.sum(sum_ref[...], axis=0, keepdims=True) * inv_n      # (1,hidp)
        ex2 = jnp.sum(sqsum_ref[...], axis=0, keepdims=True) * inv_n
        var = jnp.maximum(ex2 - mean * mean, 0.0)
        rstd = jax.lax.rsqrt(var + eps)
        scale = gamma_ref[...] * rstd
        shift = beta_ref[...] - mean * scale
        w2 = w2_ref[...]
        w2s = w2 * scale                                                  # (1,hidp)
        c = jnp.sum(shift * w2, axis=-1, keepdims=True) + b2_ref[...]     # (1,1)

        # Logit row-reduction on the MXU (idle in this pass) instead of the XLU:
        # (h * w2s) @ ones(H,128) replicates the lane-sum across 128 lanes.
        ones_mat = jnp.ones((hidp, 128), jnp.float32)

        def _clamped_softplus(u):
            # min(softplus(u), 100) == the BCE log term with PyTorch BCELoss'
            # -100 clamp, computed stably from the logit.
            return jnp.minimum(
                jnp.maximum(u, 0.0) + jnp.log(1.0 + jnp.exp(-jnp.abs(u))), 100.0)

        loss_sum = jnp.zeros((1, 1), jnp.float32)
        corr_sum = jnp.zeros((1, 1), jnp.float32)
        for ci, pi, is_pos in _PAIRINGS:
            h = jnp.clip(hc_ref[ci] + hq_ref[pi], 0.0, 6.0)
            zb = jnp.dot(h * w2s, ones_mat, preferred_element_type=jnp.float32)
            z = zb[:, 0:1] + c                                            # (tb,1)
            if is_pos:     # target 1: -log(sigmoid(z)); correct iff z > 0
                bce = _clamped_softplus(-z)
                corr = (z > 0.0).astype(jnp.float32)
            else:          # target 0: -log(1-sigmoid(z)); correct iff z <= 0
                bce = _clamped_softplus(z)
                corr = (z <= 0.0).astype(jnp.float32)
            if valid is not None:
                bce = jnp.where(valid, bce, 0.0)
                corr = jnp.where(valid, corr, 0.0)
            loss_sum = loss_sum + jnp.sum(bce, axis=0, keepdims=True)
            corr_sum = corr_sum + jnp.sum(corr, axis=0, keepdims=True)

        out_ref[:, 0:1] += loss_sum * inv_n
        out_ref[:, 1:2] += corr_sum * inv_n


def init_params(key, style_size, response_style_size=-1, hidden_dims=None):
    if hidden_dims is None:
        hidden_dims = int(style_size)
    if response_style_size <= 0:
        response_style_size = style_size
    d_in = style_size + response_style_size
    k1, k2, k3, k4 = jax.random.split(key, 4)
    lim1 = 1.0 / jnp.sqrt(d_in)
    lim2 = 1.0 / jnp.sqrt(hidden_dims)
    return {
        "w1": jax.random.uniform(k1, (d_in, hidden_dims), jnp.float32, -lim1, lim1),
        "b1": jax.random.uniform(k2, (1, hidden_dims), jnp.float32, -lim1, lim1),
        "gamma": jnp.ones((1, hidden_dims), jnp.float32),   # BatchNorm1d weight
        "beta": jnp.zeros((1, hidden_dims), jnp.float32),   # BatchNorm1d bias
        "w2": jax.random.uniform(k3, (1, hidden_dims), jnp.float32, -lim2, lim2),
        "b2": jax.random.uniform(k4, (1, 1), jnp.float32, -lim2, lim2),
    }


def _pick_tile(batch):
    if batch >= 128:
        # TODO(synk): prefer 64 on v5e (single vector-store slot).
        return 128
    return _round_up(max(batch, 1), 8)


@jax.jit
def loss_style_forward(params, context_1_style, context_2_style,
                       par_1_style, par_2_style):
    """Reproduces LossStyleModule.forward -> (loss, acc).

    Numerics: W1 / activations go through bf16 on the MXU (f32 accumulation),
    so loss matches the f32 PyTorch reference to ~1e-3 relative.
    """
    batch, style = context_1_style.shape
    resp = par_1_style.shape[1]
    hidden = params["w1"].shape[1]

    hidp = max(128, _round_up(hidden, 128))        # lane-dense hidden dim
    hpad = hidp - hidden

    # Split W1 along its input dim (x @ W1 = ctx @ W1[:style] + par @ W1[style:])
    # and zero-pad the hidden dim; padded columns have b1=gamma=beta=w2=0, so
    # the result is unchanged.
    w1 = jnp.pad(params["w1"], ((0, 0), (0, hpad)))
    w1_ctx = w1[:style].astype(jnp.bfloat16)
    w1_par = w1[style:].astype(jnp.bfloat16)
    b1 = jnp.pad(params["b1"], ((0, 0), (0, hpad)))
    gamma = jnp.pad(params["gamma"], ((0, 0), (0, hpad)))
    beta = jnp.pad(params["beta"], ((0, 0), (0, hpad)))
    w2 = jnp.pad(params["w2"], ((0, 0), (0, hpad)))
    b2 = params["b2"]

    tb = _pick_tile(batch)
    batch_p = _round_up(batch, tb)
    nb = batch_p // tb
    pad_rows = batch_p - batch

    def prep(x):
        x = x.astype(jnp.float32)                  # stays f32; bf16 cast is in-kernel
        if pad_rows:
            x = jnp.pad(x, ((0, pad_rows), (0, 0)))
        return x

    c1 = prep(context_1_style)
    c2 = prep(context_2_style)
    p1 = prep(par_1_style)
    p2 = prep(par_2_style)

    # VMEM residency decision: if the four padded input streams fit comfortably,
    # keep them resident so they are DMA'd once instead of once per BN pass.
    try:
        vmem_cap = int(pltpu.get_tpu_info().vmem_capacity_bytes)
    except Exception:
        vmem_cap = 64 * 1024 * 1024                # conservative (v7x per-TC)
    vmem_limit = min((vmem_cap * 3) // 4, 100 * 1024 * 1024)
    inp_vmem = 4 * batch_p * (2 * _round_up(style, 128) + 2 * _round_up(resp, 128))
    resident = inp_vmem <= max(vmem_limit - 12 * 1024 * 1024, 0)

    vmem_full = pl.BlockSpec(memory_space=pltpu.MemorySpace.VMEM)
    if resident:
        def in_spec(_feat):
            return vmem_full                       # whole array resident, one DMA
    else:
        def in_spec(feat):
            return pl.BlockSpec((tb, feat), lambda p, i: (i, 0))

    n_total = 4 * batch
    inv_n = 1.0 / float(n_total)
    kernel = functools.partial(
        _loss_style_kernel, tb=tb, batch=batch, hidp=hidp, resident=resident,
        inv_n=inv_n, eps=1e-5)

    in_bytes = 8 * batch_p * (style + resp) * (1 if resident else 2)
    cost = pl.CostEstimate(
        flops=int(8 * batch_p * hidp * (style + resp)
                  + 8 * batch_p * hidp * 128 + 64 * batch_p * hidp),
        transcendentals=int(4 * batch_p + 2 * hidp * nb),
        bytes_accessed=int(in_bytes + (style + resp) * hidp * 2
                           + 5 * hidp * 4 + 16),
    )

    out = pl.pallas_call(
        kernel,
        out_shape=jax.ShapeDtypeStruct((1, 2), jnp.float32),
        grid_spec=pltpu.PrefetchScalarGridSpec(
            num_scalar_prefetch=0,
            grid=(2, nb),                          # (BN pass, batch tile)
            in_specs=[
                in_spec(style), in_spec(style), in_spec(resp), in_spec(resp),
                vmem_full, vmem_full, vmem_full, vmem_full, vmem_full,
                vmem_full, vmem_full,
            ],
            out_specs=vmem_full,
            scratch_shapes=[
                pltpu.VMEM((2, tb, hidp), jnp.float32),   # ctx halves of Linear-1 (+b1)
                pltpu.VMEM((2, tb, hidp), jnp.float32),   # par halves of Linear-1
                pltpu.VMEM((8, hidp), jnp.float32),       # sublane-partial sum(h)
                pltpu.VMEM((8, hidp), jnp.float32),       # sublane-partial sum(h^2)
            ],
        ),
        compiler_params=pltpu.CompilerParams(
            dimension_semantics=("arbitrary", "arbitrary"),
            vmem_limit_bytes=int(vmem_limit),
        ),
        cost_estimate=cost,
    )(c1, c2, p1, p2, w1_ctx, w1_par, b1, gamma, beta, w2, b2)

    return out[0, 0], out[0, 1]


if __name__ == "__main__":
    style_size = 32
    response_style_size = 32
    hidden_dims = 32
    batch = 2

    key = jax.random.PRNGKey(0)
    kp, k1, k2, k3, k4 = jax.random.split(key, 5)
    params = init_params(kp, style_size, response_style_size, hidden_dims)

    context_1 = jax.random.normal(k1, (batch, style_size), jnp.float32)
    context_2 = jax.random.normal(k2, (batch, style_size), jnp.float32)
    par_1 = jax.random.normal(k3, (batch, response_style_size), jnp.float32)
    par_2 = jax.random.normal(k4, (batch, response_style_size), jnp.float32)

    loss, acc = loss_style_forward(params, context_1, context_2, par_1, par_2)
    loss, acc = jax.block_until_ready((loss, acc))
    assert bool(jnp.isfinite(loss)) and 0.0 <= float(acc) <= 1.0
    print("KERNEL_OK")
</pallas_src>

<mosaic_0001>
module attributes {stable_mosaic.version = 11 : i64} {
  func.func @_loss_style_kernel(%arg0: i32, %arg1: i32, %arg2: memref<8x32xf32, #tpu.memory_space<vmem>>, %arg3: memref<8x32xf32, #tpu.memory_space<vmem>>, %arg4: memref<8x32xf32, #tpu.memory_space<vmem>>, %arg5: memref<8x32xf32, #tpu.memory_space<vmem>>, %arg6: memref<32x128xbf16, #tpu.memory_space<vmem>>, %arg7: memref<32x128xbf16, #tpu.memory_space<vmem>>, %arg8: memref<1x128xf32, #tpu.memory_space<vmem>>, %arg9: memref<1x128xf32, #tpu.memory_space<vmem>>, %arg10: memref<1x128xf32, #tpu.memory_space<vmem>>, %arg11: memref<1x128xf32, #tpu.memory_space<vmem>>, %arg12: memref<1x1xf32, #tpu.memory_space<vmem>>, %arg13: memref<1x2xf32, #tpu.memory_space<vmem>>, %arg14: memref<2x8x128xf32, #tpu.memory_space<vmem>>, %arg15: memref<2x8x128xf32, #tpu.memory_space<vmem>>, %arg16: memref<8x128xf32, #tpu.memory_space<vmem>>, %arg17: memref<8x128xf32, #tpu.memory_space<vmem>>) attributes {dimension_semantics = [#tpu.dimension_semantics<arbitrary>, #tpu.dimension_semantics<arbitrary>], iteration_bounds = array<i64: 2, 1>, scalar_prefetch = 0 : i64, scratch_operands = 4 : i64, tpu.core_type = #tpu.core_type<tc>, window_params = [{pipeline_mode = #tpu.pipeline_mode<synchronous>, transform_indices = @transform_0, window_bounds = array<i64: 8, 32>}, {pipeline_mode = #tpu.pipeline_mode<synchronous>, transform_indices = @transform_1, window_bounds = array<i64: 8, 32>}, {pipeline_mode = #tpu.pipeline_mode<synchronous>, transform_indices = @transform_2, window_bounds = array<i64: 8, 32>}, {pipeline_mode = #tpu.pipeline_mode<synchronous>, transform_indices = @transform_3, window_bounds = array<i64: 8, 32>}, {pipeline_mode = #tpu.pipeline_mode<synchronous>, transform_indices = @transform_4, window_bounds = array<i64: 32, 128>}, {pipeline_mode = #tpu.pipeline_mode<synchronous>, transform_indices = @transform_5, window_bounds = array<i64: 32, 128>}, {pipeline_mode = #tpu.pipeline_mode<synchronous>, transform_indices = @transform_6, window_bounds = array<i64: 1, 128>}, {pipeline_mode = #tpu.pipeline_mode<synchronous>, transform_indices = @transform_7, window_bounds = array<i64: 1, 128>}, {pipeline_mode = #tpu.pipeline_mode<synchronous>, transform_indices = @transform_8, window_bounds = array<i64: 1, 128>}, {pipeline_mode = #tpu.pipeline_mode<synchronous>, transform_indices = @transform_9, window_bounds = array<i64: 1, 128>}, {pipeline_mode = #tpu.pipeline_mode<synchronous>, transform_indices = @transform_10, window_bounds = array<i64: 1, 1>}, {pipeline_mode = #tpu.pipeline_mode<synchronous>, transform_indices = @transform_11, window_bounds = array<i64: 1, 2>}]} {
    %c8_i32 = arith.constant 8 : i32
    %0 = arith.muli %arg1, %c8_i32 : i32
    %1 = tpu.assume_multiple %0, 8 : i32
    %c0 = arith.constant 0 : index
    %c0_0 = arith.constant 0 : index
    %2 = vector.load %arg8[%c0, %c0_0] : memref<1x128xf32, #tpu.memory_space<vmem>>, vector<1x128xf32>
    %3 = arith.index_cast %1 : i32 to index
    %c0_1 = arith.constant 0 : index
    %4 = vector.load %arg2[%3, %c0_1] : memref<8x32xf32, #tpu.memory_space<vmem>>, vector<8x32xf32>
    %5 = arith.truncf %4 : vector<8x32xf32> to vector<8x32xbf16>
    %c0_2 = arith.constant 0 : index
    %c0_3 = arith.constant 0 : index
    %6 = vector.load %arg6[%c0_2, %c0_3] : memref<32x128xbf16, #tpu.memory_space<vmem>>, vector<32x128xbf16>
    %cst = arith.constant dense<0.000000e+00> : vector<8x128xf32>
    %7 = tpu.matmul %5, %6, %cst {dimension_numbers = #tpu.dot_dimension_numbers<[1], [0], [0], [1], [0, 0, 1, 1], [], []>} : vector<8x32xbf16>, vector<32x128xbf16>, vector<8x128xf32> -> vector<8x128xf32>
    %8 = vector.broadcast %2 : vector<1x128xf32> to vector<8x128xf32>
    %9 = arith.addf %7, %8 : vector<8x128xf32>
    %c0_4 = arith.constant 0 : index
    %c0_5 = arith.constant 0 : index
    %c0_6 = arith.constant 0 : index
    %10 = vector.load %arg14[%c0_4, %c0_5, %c0_6] : memref<2x8x128xf32, #tpu.memory_space<vmem>>, vector<1x8x128xf32>
    %11 = vector.shape_cast %10 : vector<1x8x128xf32> to vector<8x128xf32>
    %12 = vector.shape_cast %9 : vector<8x128xf32> to vector<1x8x128xf32>
    tpu.vector_store %arg14[%c0_4, %c0_5, %c0_6], %12 {strides = array<i32>} : memref<2x8x128xf32, #tpu.memory_space<vmem>>, vector<1x8x128xf32>,
    %13 = arith.index_cast %1 : i32 to index
    %c0_7 = arith.constant 0 : index
    %14 = vector.load %arg3[%13, %c0_7] : memref<8x32xf32, #tpu.memory_space<vmem>>, vector<8x32xf32>
    %15 = arith.truncf %14 : vector<8x32xf32> to vector<8x32xbf16>
    %c0_8 = arith.constant 0 : index
    %c0_9 = arith.constant 0 : index
    %16 = vector.load %arg6[%c0_8, %c0_9] : memref<32x128xbf16, #tpu.memory_space<vmem>>, vector<32x128xbf16>
    %cst_10 = arith.constant dense<0.000000e+00> : vector<8x128xf32>
    %17 = tpu.matmul %15, %16, %cst_10 {dimension_numbers = #tpu.dot_dimension_numbers<[1], [0], [0], [1], [0, 0, 1, 1], [], []>} : vector<8x32xbf16>, vector<32x128xbf16>, vector<8x128xf32> -> vector<8x128xf32>
    %18 = vector.broadcast %2 : vector<1x128xf32> to vector<8x128xf32>
    %19 = arith.addf %17, %18 : vector<8x128xf32>
    %c1 = arith.constant 1 : index
    %c0_11 = arith.constant 0 : index
    %c0_12 = arith.constant 0 : index
    %20 = vector.load %arg14[%c1, %c0_11, %c0_12] : memref<2x8x128xf32, #tpu.memory_space<vmem>>, vector<1x8x128xf32>
    %21 = vector.shape_cast %20 : vector<1x8x128xf32> to vector<8x128xf32>
    %22 = vector.shape_cast %19 : vector<8x128xf32> to vector<1x8x128xf32>
    tpu.vector_store %arg14[%c1, %c0_11, %c0_12], %22 {strides = array<i32>} : memref<2x8x128xf32, #tpu.memory_space<vmem>>, vector<1x8x128xf32>,
    %23 = arith.index_cast %1 : i32 to index
    %c0_13 = arith.constant 0 : index
    %24 = vector.load %arg4[%23, %c0_13] : memref<8x32xf32, #tpu.memory_space<vmem>>, vector<8x32xf32>
    %25 = arith.truncf %24 : vector<8x32xf32> to vector<8x32xbf16>
    %c0_14 = arith.constant 0 : index
    %c0_15 = arith.constant 0 : index
    %26 = vector.load %arg7[%c0_14, %c0_15] : memref<32x128xbf16, #tpu.memory_space<vmem>>, vector<32x128xbf16>
    %cst_16 = arith.constant dense<0.000000e+00> : vector<8x128xf32>
    %27 = tpu.matmul %25, %26, %cst_16 {dimension_numbers = #tpu.dot_dimension_numbers<[1], [0], [0], [1], [0, 0, 1, 1], [], []>} : vector<8x32xbf16>, vector<32x128xbf16>, vector<8x128xf32> -> vector<8x128xf32>
    %c0_17 = arith.constant 0 : index
    %c0_18 = arith.constant 0 : index
    %c0_19 = arith.constant 0 : index
    %28 = vector.load %arg15[%c0_17, %c0_18, %c0_19] : memref<2x8x128xf32, #tpu.memory_space<vmem>>, vector<1x8x128xf32>
    %29 = vector.shape_cast %28 : vector<1x8x128xf32> to vector<8x128xf32>
    %30 = vector.shape_cast %27 : vector<8x128xf32> to vector<1x8x128xf32>
    tpu.vector_store %arg15[%c0_17, %c0_18, %c0_19], %30 {strides = array<i32>} : memref<2x8x128xf32, #tpu.memory_space<vmem>>, vector<1x8x128xf32>,
    %31 = arith.index_cast %1 : i32 to index
    %c0_20 = arith.constant 0 : index
    %32 = vector.load %arg5[%31, %c0_20] : memref<8x32xf32, #tpu.memory_space<vmem>>, vector<8x32xf32>
    %33 = arith.truncf %32 : vector<8x32xf32> to vector<8x32xbf16>
    %c0_21 = arith.constant 0 : index
    %c0_22 = arith.constant 0 : index
    %34 = vector.load %arg7[%c0_21, %c0_22] : memref<32x128xbf16, #tpu.memory_space<vmem>>, vector<32x128xbf16>
    %cst_23 = arith.constant dense<0.000000e+00> : vector<8x128xf32>
    %35 = tpu.matmul %33, %34, %cst_23 {dimension_numbers = #tpu.dot_dimension_numbers<[1], [0], [0], [1], [0, 0, 1, 1], [], []>} : vector<8x32xbf16>, vector<32x128xbf16>, vector<8x128xf32> -> vector<8x128xf32>
    %c1_24 = arith.constant 1 : index
    %c0_25 = arith.constant 0 : index
    %c0_26 = arith.constant 0 : index
    %36 = vector.load %arg15[%c1_24, %c0_25, %c0_26] : memref<2x8x128xf32, #tpu.memory_space<vmem>>, vector<1x8x128xf32>
    %37 = vector.shape_cast %36 : vector<1x8x128xf32> to vector<8x128xf32>
    %38 = vector.shape_cast %35 : vector<8x128xf32> to vector<1x8x128xf32>
    tpu.vector_store %arg15[%c1_24, %c0_25, %c0_26], %38 {strides = array<i32>} : memref<2x8x128xf32, #tpu.memory_space<vmem>>, vector<1x8x128xf32>,
    %c8_i32_27 = arith.constant 8 : i32
    %39 = arith.muli %arg1, %c8_i32_27 : i32
    %40 = tpu.iota {dimensions = array<i32: 0>} : vector<8x1xi32>
    %41 = vector.broadcast %39 : i32 to vector<8x1xi32>
    %42 = arith.addi %41, %40 : vector<8x1xi32>
    %c2_i32 = arith.constant 2 : i32
    %43 = vector.broadcast %c2_i32 : i32 to vector<8x1xi32>
    %44 = arith.cmpi slt, %42, %43 : vector<8x1xi32>
    %c0_i32 = arith.constant 0 : i32
    %45 = arith.cmpi eq, %arg0, %c0_i32 : i32
    %46 = arith.extui %45 : i1 to i32
    %c0_i32_28 = arith.constant 0 : i32
    %47 = arith.cmpi ne, %46, %c0_i32_28 : i32
    scf.if %47 {
      %c0_i32_30 = arith.constant 0 : i32
      %51 = arith.cmpi eq, %arg1, %c0_i32_30 : i32
      %52 = arith.extui %51 : i1 to i32
      %c0_i32_31 = arith.constant 0 : i32
      %53 = arith.cmpi ne, %52, %c0_i32_31 : i32
      scf.if %53 {
        %cst_78 = arith.constant 0.000000e+00 : f32
        %126 = vector.broadcast %cst_78 : f32 to vector<8x128xf32>
        %c0_79 = arith.constant 0 : index
        %c0_80 = arith.constant 0 : index
        %127 = vector.load %arg16[%c0_79, %c0_80] : memref<8x128xf32, #tpu.memory_space<vmem>>, vector<8x128xf32>
        tpu.vector_store %arg16[%c0_79, %c0_80], %126 {strides = array<i32>} : memref<8x128xf32, #tpu.memory_space<vmem>>, vector<8x128xf32>,
        %cst_81 = arith.constant 0.000000e+00 : f32
        %128 = vector.broadcast %cst_81 : f32 to vector<8x128xf32>
        %c0_82 = arith.constant 0 : index
        %c0_83 = arith.constant 0 : index
        %129 = vector.load %arg17[%c0_82, %c0_83] : memref<8x128xf32, #tpu.memory_space<vmem>>, vector<8x128xf32>
        tpu.vector_store %arg17[%c0_82, %c0_83], %128 {strides = array<i32>} : memref<8x128xf32, #tpu.memory_space<vmem>>, vector<8x128xf32>,
      } else {
      }
      %cst_32 = arith.constant 0.000000e+00 : f32
      %54 = vector.broadcast %cst_32 : f32 to vector<8x128xf32>
      %cst_33 = arith.constant 0.000000e+00 : f32
      %55 = vector.broadcast %cst_33 : f32 to vector<8x128xf32>
      %c0_34 = arith.constant 0 : index
      %c0_35 = arith.constant 0 : index
      %c0_36 = arith.constant 0 : index
      %56 = vector.load %arg14[%c0_34, %c0_35, %c0_36] : memref<2x8x128xf32, #tpu.memory_space<vmem>>, vector<1x8x128xf32>
      %57 = vector.shape_cast %56 : vector<1x8x128xf32> to vector<8x128xf32>
      %c0_37 = arith.constant 0 : index
      %c0_38 = arith.constant 0 : index
      %c0_39 = arith.constant 0 : index
      %58 = vector.load %arg15[%c0_37, %c0_38, %c0_39] : memref<2x8x128xf32, #tpu.memory_space<vmem>>, vector<1x8x128xf32>
      %59 = vector.shape_cast %58 : vector<1x8x128xf32> to vector<8x128xf32>
      %60 = arith.addf %57, %59 : vector<8x128xf32>
      %cst_40 = arith.constant 0.000000e+00 : f32
      %cst_41 = arith.constant 6.000000e+00 : f32
      %61 = vector.broadcast %cst_40 : f32 to vector<8x128xf32>
      %62 = arith.maximumf %61, %60 : vector<8x128xf32>
      %63 = vector.broadcast %cst_41 : f32 to vector<8x128xf32>
      %64 = arith.minimumf %63, %62 : vector<8x128xf32>
      %cst_42 = arith.constant 0.000000e+00 : f32
      %65 = vector.shape_cast %44 : vector<8x1xi1> to vector<8x1xi1>
      %66 = vector.broadcast %65 : vector<8x1xi1> to vector<8x128xi1>
      %67 = vector.broadcast %cst_42 : f32 to vector<8x128xf32>
      %68 = arith.select %66, %64, %67 : vector<8x128xi1>, vector<8x128xf32>
      %69 = arith.addf %54, %68 : vector<8x128xf32>
      %70 = arith.mulf %68, %68 : vector<8x128xf32>
      %71 = arith.addf %55, %70 : vector<8x128xf32>
      %c0_43 = arith.constant 0 : index
      %c0_44 = arith.constant 0 : index
      %c0_45 = arith.constant 0 : index
      %72 = vector.load %arg14[%c0_43, %c0_44, %c0_45] : memref<2x8x128xf32, #tpu.memory_space<vmem>>, vector<1x8x128xf32>
      %73 = vector.shape_cast %72 : vector<1x8x128xf32> to vector<8x128xf32>
      %c1_46 = arith.constant 1 : index
      %c0_47 = arith.constant 0 : index
      %c0_48 = arith.constant 0 : index
      %74 = vector.load %arg15[%c1_46, %c0_47, %c0_48] : memref<2x8x128xf32, #tpu.memory_space<vmem>>, vector<1x8x128xf32>
      %75 = vector.shape_cast %74 : vector<1x8x128xf32> to vector<8x128xf32>
      %76 = arith.addf %73, %75 : vector<8x128xf32>
      %cst_49 = arith.constant 0.000000e+00 : f32
      %cst_50 = arith.constant 6.000000e+00 : f32
      %77 = vector.broadcast %cst_49 : f32 to vector<8x128xf32>
      %78 = arith.maximumf %77, %76 : vector<8x128xf32>
      %79 = vector.broadcast %cst_50 : f32 to vector<8x128xf32>
      %80 = arith.minimumf %79, %78 : vector<8x128xf32>
      %cst_51 = arith.constant 0.000000e+00 : f32
      %81 = vector.shape_cast %44 : vector<8x1xi1> to vector<8x1xi1>
      %82 = vector.broadcast %81 : vector<8x1xi1> to vector<8x128xi1>
      %83 = vector.broadcast %cst_51 : f32 to vector<8x128xf32>
      %84 = arith.select %82, %80, %83 : vector<8x128xi1>, vector<8x128xf32>
      %85 = arith.addf %69, %84 : vector<8x128xf32>
      %86 = arith.mulf %84, %84 : vector<8x128xf32>
      %87 = arith.addf %71, %86 : vector<8x128xf32>
      %c1_52 = arith.constant 1 : index
      %c0_53 = arith.constant 0 : index
      %c0_54 = arith.constant 0 : index
      %88 = vector.load %arg14[%c1_52, %c0_53, %c0_54] : memref<2x8x128xf32, #tpu.memory_space<vmem>>, vector<1x8x128xf32>
      %89 = vector.shape_cast %88 : vector<1x8x128xf32> to vector<8x128xf32>
      %c1_55 = arith.constant 1 : index
      %c0_56 = arith.constant 0 : index
      %c0_57 = arith.constant 0 : index
      %90 = vector.load %arg15[%c1_55, %c0_56, %c0_57] : memref<2x8x128xf32, #tpu.memory_space<vmem>>, vector<1x8x128xf32>
      %91 = vector.shape_cast %90 : vector<1x8x128xf32> to vector<8x128xf32>
      %92 = arith.addf %89, %91 : vector<8x128xf32>
      %cst_58 = arith.constant 0.000000e+00 : f32
      %cst_59 = arith.constant 6.000000e+00 : f32
      %93 = vector.broadcast %cst_58 : f32 to vector<8x128xf32>
      %94 = arith.maximumf %93, %92 : vector<8x128xf32>
      %95 = vector.broadcast %cst_59 : f32 to vector<8x128xf32>
      %96 = arith.minimumf %95, %94 : vector<8x128xf32>
      %cst_60 = arith.constant 0.000000e+00 : f32
      %97 = vector.shape_cast %44 : vector<8x1xi1> to vector<8x1xi1>
      %98 = vector.broadcast %97 : vector<8x1xi1> to vector<8x128xi1>
      %99 = vector.broadcast %cst_60 : f32 to vector<8x128xf32>
      %100 = arith.select %98, %96, %99 : vector<8x128xi1>, vector<8x128xf32>
      %101 = arith.addf %85, %100 : vector<8x128xf32>
      %102 = arith.mulf %100, %100 : vector<8x128xf32>
      %103 = arith.addf %87, %102 : vector<8x128xf32>
      %c1_61 = arith.constant 1 : index
      %c0_62 = arith.constant 0 : index
      %c0_63 = arith.constant 0 : index
      %104 = vector.load %arg14[%c1_61, %c0_62, %c0_63] : memref<2x8x128xf32, #tpu.memory_space<vmem>>, vector<1x8x128xf32>
      %105 = vector.shape_cast %104 : vector<1x8x128xf32> to vector<8x128xf32>
      %c0_64 = arith.constant 0 : index
      %c0_65 = arith.constant 0 : index
      %c0_66 = arith.constant 0 : index
      %106 = vector.load %arg15[%c0_64, %c0_65, %c0_66] : memref<2x8x128xf32, #tpu.memory_space<vmem>>, vector<1x8x128xf32>
      %107 = vector.shape_cast %106 : vector<1x8x128xf32> to vector<8x128xf32>
      %108 = arith.addf %105, %107 : vector<8x128xf32>
      %cst_67 = arith.constant 0.000000e+00 : f32
      %cst_68 = arith.constant 6.000000e+00 : f32
      %109 = vector.broadcast %cst_67 : f32 to vector<8x128xf32>
      %110 = arith.maximumf %109, %108 : vector<8x128xf32>
      %111 = vector.broadcast %cst_68 : f32 to vector<8x128xf32>
      %112 = arith.minimumf %111, %110 : vector<8x128xf32>
      %cst_69 = arith.constant 0.000000e+00 : f32
      %113 = vector.shape_cast %44 : vector<8x1xi1> to vector<8x1xi1>
      %114 = vector.broadcast %113 : vector<8x1xi1> to vector<8x128xi1>
      %115 = vector.broadcast %cst_69 : f32 to vector<8x128xf32>
      %116 = arith.select %114, %112, %115 : vector<8x128xi1>, vector<8x128xf32>
      %117 = arith.addf %101, %116 : vector<8x128xf32>
      %118 = arith.mulf %116, %116 : vector<8x128xf32>
      %119 = arith.addf %103, %118 : vector<8x128xf32>
      %c0_70 = arith.constant 0 : index
      %c0_71 = arith.constant 0 : index
      %120 = vector.load %arg16[%c0_70, %c0_71] : memref<8x128xf32, #tpu.memory_space<vmem>>, vector<8x128xf32>
      %121 = arith.addf %120, %117 : vector<8x128xf32>
      %c0_72 = arith.constant 0 : index
      %c0_73 = arith.constant 0 : index
      %122 = vector.load %arg16[%c0_72, %c0_73] : memref<8x128xf32, #tpu.memory_space<vmem>>, vector<8x128xf32>
      tpu.vector_store %arg16[%c0_72, %c0_73], %121 {strides = array<i32>} : memref<8x128xf32, #tpu.memory_space<vmem>>, vector<8x128xf32>,
      %c0_74 = arith.constant 0 : index
      %c0_75 = arith.constant 0 : index
      %123 = vector.load %arg17[%c0_74, %c0_75] : memref<8x128xf32, #tpu.memory_space<vmem>>, vector<8x128xf32>
      %124 = arith.addf %123, %119 : vector<8x128xf32>
      %c0_76 = arith.constant 0 : index
      %c0_77 = arith.constant 0 : index
      %125 = vector.load %arg17[%c0_76, %c0_77] : memref<8x128xf32, #tpu.memory_space<vmem>>, vector<8x128xf32>
      tpu.vector_store %arg17[%c0_76, %c0_77], %124 {strides = array<i32>} : memref<8x128xf32, #tpu.memory_space<vmem>>, vector<8x128xf32>,
    } else {
    }
    %c1_i32 = arith.constant 1 : i32
    %48 = arith.cmpi eq, %arg0, %c1_i32 : i32
    %49 = arith.extui %48 : i1 to i32
    %c0_i32_29 = arith.constant 0 : i32
    %50 = arith.cmpi ne, %49, %c0_i32_29 : i32
    scf.if %50 {
      %c0_i32_30 = arith.constant 0 : i32
      %51 = arith.cmpi eq, %arg1, %c0_i32_30 : i32
      %52 = arith.extui %51 : i1 to i32
      %c0_i32_31 = arith.constant 0 : i32
      %53 = arith.cmpi ne, %52, %c0_i32_31 : i32
      scf.if %53 {
        %cst_138 = arith.constant 0.000000e+00 : f32
        %264 = vector.broadcast %cst_138 : f32 to vector<1x2xf32>
        %c0_139 = arith.constant 0 : index
        %c0_140 = arith.constant 0 : index
        %265 = vector.load %arg13[%c0_139, %c0_140] : memref<1x2xf32, #tpu.memory_space<vmem>>, vector<1x2xf32>
        tpu.vector_store %arg13[%c0_139, %c0_140], %264 {strides = array<i32>} : memref<1x2xf32, #tpu.memory_space<vmem>>, vector<1x2xf32>,
      } else {
      }
      %c0_32 = arith.constant 0 : index
      %c0_33 = arith.constant 0 : index
      %54 = vector.load %arg16[%c0_32, %c0_33] : memref<8x128xf32, #tpu.memory_space<vmem>>, vector<8x128xf32>
      %cst_34 = arith.constant dense<0.000000e+00> : vector<128xf32>
      %55 = vector.multi_reduction <add>, %54, %cst_34 [0] : vector<8x128xf32> to vector<128xf32>
      %56 = vector.shape_cast %55 : vector<128xf32> to vector<1x128xf32>
      %cst_35 = arith.constant 1.250000e-01 : f32
      %57 = vector.broadcast %cst_35 : f32 to vector<1x128xf32>
      %58 = arith.mulf %56, %57 : vector<1x128xf32>
      %c0_36 = arith.constant 0 : index
      %c0_37 = arith.constant 0 : index
      %59 = vector.load %arg17[%c0_36, %c0_37] : memref<8x128xf32, #tpu.memory_space<vmem>>, vector<8x128xf32>
      %cst_38 = arith.constant dense<0.000000e+00> : vector<128xf32>
      %60 = vector.multi_reduction <add>, %59, %cst_38 [0] : vector<8x128xf32> to vector<128xf32>
      %61 = vector.shape_cast %60 : vector<128xf32> to vector<1x128xf32>
      %cst_39 = arith.constant 1.250000e-01 : f32
      %62 = vector.broadcast %cst_39 : f32 to vector<1x128xf32>
      %63 = arith.mulf %61, %62 : vector<1x128xf32>
      %64 = arith.mulf %58, %58 : vector<1x128xf32>
      %65 = arith.subf %63, %64 : vector<1x128xf32>
      %cst_40 = arith.constant 0.000000e+00 : f32
      %66 = vector.broadcast %cst_40 : f32 to vector<1x128xf32>
      %67 = arith.maximumf %65, %66 : vector<1x128xf32>
      %cst_41 = arith.constant 9.99999974E-6 : f32
      %68 = vector.broadcast %cst_41 : f32 to vector<1x128xf32>
      %69 = arith.addf %67, %68 : vector<1x128xf32>
      %70 = math.rsqrt %69 : vector<1x128xf32>
      %c0_42 = arith.constant 0 : index
      %c0_43 = arith.constant 0 : index
      %71 = vector.load %arg9[%c0_42, %c0_43] : memref<1x128xf32, #tpu.memory_space<vmem>>, vector<1x128xf32>
      %72 = arith.mulf %71, %70 : vector<1x128xf32>
      %c0_44 = arith.constant 0 : index
      %c0_45 = arith.constant 0 : index
      %73 = vector.load %arg10[%c0_44, %c0_45] : memref<1x128xf32, #tpu.memory_space<vmem>>, vector<1x128xf32>
      %74 = arith.mulf %58, %72 : vector<1x128xf32>
      %75 = arith.subf %73, %74 : vector<1x128xf32>
      %c0_46 = arith.constant 0 : index
      %c0_47 = arith.constant 0 : index
      %76 = vector.load %arg11[%c0_46, %c0_47] : memref<1x128xf32, #tpu.memory_space<vmem>>, vector<1x128xf32>
      %77 = arith.mulf %76, %72 : vector<1x128xf32>
      %78 = arith.mulf %75, %76 : vector<1x128xf32>
      %cst_48 = arith.constant dense<0.000000e+00> : vector<1xf32>
      %79 = vector.multi_reduction <add>, %78, %cst_48 [1] : vector<1x128xf32> to vector<1xf32>
      %80 = vector.shape_cast %79 : vector<1xf32> to vector<1x1xf32>
      %c0_49 = arith.constant 0 : index
      %c0_50 = arith.constant 0 : index
      %81 = vector.load %arg12[%c0_49, %c0_50] : memref<1x1xf32, #tpu.memory_space<vmem>>, vector<1x1xf32>
      %82 = arith.addf %80, %81 : vector<1x1xf32>
      %cst_51 = arith.constant 1.000000e+00 : f32
      %83 = vector.broadcast %cst_51 : f32 to vector<128x128xf32>
      %cst_52 = arith.constant 0.000000e+00 : f32
      %84 = vector.broadcast %cst_52 : f32 to vector<1x1xf32>
      %cst_53 = arith.constant 0.000000e+00 : f32
      %85 = vector.broadcast %cst_53 : f32 to vector<1x1xf32>
      %c0_54 = arith.constant 0 : index
      %c0_55 = arith.constant 0 : index
      %c0_56 = arith.constant 0 : index
      %86 = vector.load %arg14[%c0_54, %c0_55, %c0_56] : memref<2x8x128xf32, #tpu.memory_space<vmem>>, vector<1x8x128xf32>
      %87 = vector.shape_cast %86 : vector<1x8x128xf32> to vector<8x128xf32>
      %c0_57 = arith.constant 0 : index
      %c0_58 = arith.constant 0 : index
      %c0_59 = arith.constant 0 : index
      %88 = vector.load %arg15[%c0_57, %c0_58, %c0_59] : memref<2x8x128xf32, #tpu.memory_space<vmem>>, vector<1x8x128xf32>
      %89 = vector.shape_cast %88 : vector<1x8x128xf32> to vector<8x128xf32>
      %90 = arith.addf %87, %89 : vector<8x128xf32>
      %cst_60 = arith.constant 0.000000e+00 : f32
      %cst_61 = arith.constant 6.000000e+00 : f32
      %91 = vector.broadcast %cst_60 : f32 to vector<8x128xf32>
      %92 = arith.maximumf %91, %90 : vector<8x128xf32>
      %93 = vector.broadcast %cst_61 : f32 to vector<8x128xf32>
      %94 = arith.minimumf %93, %92 : vector<8x128xf32>
      %95 = vector.broadcast %77 : vector<1x128xf32> to vector<8x128xf32>
      %96 = arith.mulf %94, %95 : vector<8x128xf32>
      %cst_62 = arith.constant dense<0.000000e+00> : vector<8x128xf32>
      %97 = tpu.matmul %96, %83, %cst_62 {dimension_numbers = #tpu.dot_dimension_numbers<[1], [0], [0], [1], [0, 0, 1, 1], [], []>} : vector<8x128xf32>, vector<128x128xf32>, vector<8x128xf32> -> vector<8x128xf32>
      %98 = vector.extract_strided_slice %97 {offsets = [0, 0], sizes = [8, 1], strides = [1, 1]} : vector<8x128xf32> to vector<8x1xf32>
      %99 = vector.broadcast %82 : vector<1x1xf32> to vector<8x1xf32>
      %100 = arith.addf %98, %99 : vector<8x1xf32>
      %cst_63 = arith.constant 0.000000e+00 : f32
      %101 = vector.broadcast %cst_63 : f32 to vector<8x1xf32>
      %102 = arith.subf %101, %100 : vector<8x1xf32>
      %cst_64 = arith.constant 0.000000e+00 : f32
      %103 = vector.broadcast %cst_64 : f32 to vector<8x1xf32>
      %104 = arith.maximumf %102, %103 : vector<8x1xf32>
      %105 = math.absf %102 : vector<8x1xf32>
      %cst_65 = arith.constant 0.000000e+00 : f32
      %106 = vector.broadcast %cst_65 : f32 to vector<8x1xf32>
      %107 = arith.subf %106, %105 : vector<8x1xf32>
      %108 = math.exp %107 : vector<8x1xf32>
      %cst_66 = arith.constant 1.000000e+00 : f32
      %109 = vector.broadcast %cst_66 : f32 to vector<8x1xf32>
      %110 = arith.addf %109, %108 : vector<8x1xf32>
      %111 = math.log %110 : vector<8x1xf32>
      %112 = arith.addf %104, %111 : vector<8x1xf32>
      %cst_67 = arith.constant 1.000000e+02 : f32
      %113 = vector.broadcast %cst_67 : f32 to vector<8x1xf32>
      %114 = arith.minimumf %112, %113 : vector<8x1xf32>
      %cst_68 = arith.constant 0.000000e+00 : f32
      %115 = vector.broadcast %cst_68 : f32 to vector<8x1xf32>
      %116 = arith.cmpf ogt, %100, %115 : vector<8x1xf32>
      %117 = arith.extui %116 : vector<8x1xi1> to vector<8x1xi32>
      %118 = arith.sitofp %117 : vector<8x1xi32> to vector<8x1xf32>
      %cst_69 = arith.constant 0.000000e+00 : f32
      %119 = vector.broadcast %cst_69 : f32 to vector<8x1xf32>
      %120 = arith.select %44, %114, %119 : vector<8x1xi1>, vector<8x1xf32>
      %cst_70 = arith.constant 0.000000e+00 : f32
      %121 = vector.broadcast %cst_70 : f32 to vector<8x1xf32>
      %122 = arith.select %44, %118, %121 : vector<8x1xi1>, vector<8x1xf32>
      %cst_71 = arith.constant dense<0.000000e+00> : vector<1xf32>
      %123 = vector.multi_reduction <add>, %120, %cst_71 [0] : vector<8x1xf32> to vector<1xf32>
      %124 = vector.shape_cast %123 : vector<1xf32> to vector<1x1xf32>
      %125 = arith.addf %84, %124 : vector<1x1xf32>
      %cst_72 = arith.constant dense<0.000000e+00> : vector<1xf32>
      %126 = vector.multi_reduction <add>, %122, %cst_72 [0] : vector<8x1xf32> to vector<1xf32>
      %127 = vector.shape_cast %126 : vector<1xf32> to vector<1x1xf32>
      %128 = arith.addf %85, %127 : vector<1x1xf32>
      %c0_73 = arith.constant 0 : index
      %c0_74 = arith.constant 0 : index
      %c0_75 = arith.constant 0 : index
      %129 = vector.load %arg14[%c0_73, %c0_74, %c0_75] : memref<2x8x128xf32, #tpu.memory_space<vmem>>, vector<1x8x128xf32>
      %130 = vector.shape_cast %129 : vector<1x8x128xf32> to vector<8x128xf32>
      %c1_76 = arith.constant 1 : index
      %c0_77 = arith.constant 0 : index
      %c0_78 = arith.constant 0 : index
      %131 = vector.load %arg15[%c1_76, %c0_77, %c0_78] : memref<2x8x128xf32, #tpu.memory_space<vmem>>, vector<1x8x128xf32>
      %132 = vector.shape_cast %131 : vector<1x8x128xf32> to vector<8x128xf32>
      %133 = arith.addf %130, %132 : vector<8x128xf32>
      %cst_79 = arith.constant 0.000000e+00 : f32
      %cst_80 = arith.constant 6.000000e+00 : f32
      %134 = vector.broadcast %cst_79 : f32 to vector<8x128xf32>
      %135 = arith.maximumf %134, %133 : vector<8x128xf32>
      %136 = vector.broadcast %cst_80 : f32 to vector<8x128xf32>
      %137 = arith.minimumf %136, %135 : vector<8x128xf32>
      %138 = vector.broadcast %77 : vector<1x128xf32> to vector<8x128xf32>
      %139 = arith.mulf %137, %138 : vector<8x128xf32>
      %cst_81 = arith.constant dense<0.000000e+00> : vector<8x128xf32>
      %140 = tpu.matmul %139, %83, %cst_81 {dimension_numbers = #tpu.dot_dimension_numbers<[1], [0], [0], [1], [0, 0, 1, 1], [], []>} : vector<8x128xf32>, vector<128x128xf32>, vector<8x128xf32> -> vector<8x128xf32>
      %141 = vector.extract_strided_slice %140 {offsets = [0, 0], sizes = [8, 1], strides = [1, 1]} : vector<8x128xf32> to vector<8x1xf32>
      %142 = vector.broadcast %82 : vector<1x1xf32> to vector<8x1xf32>
      %143 = arith.addf %141, %142 : vector<8x1xf32>
      %cst_82 = arith.constant 0.000000e+00 : f32
      %144 = vector.broadcast %cst_82 : f32 to vector<8x1xf32>
      %145 = arith.maximumf %143, %144 : vector<8x1xf32>
      %146 = math.absf %143 : vector<8x1xf32>
      %cst_83 = arith.constant 0.000000e+00 : f32
      %147 = vector.broadcast %cst_83 : f32 to vector<8x1xf32>
      %148 = arith.subf %147, %146 : vector<8x1xf32>
      %149 = math.exp %148 : vector<8x1xf32>
      %cst_84 = arith.constant 1.000000e+00 : f32
      %150 = vector.broadcast %cst_84 : f32 to vector<8x1xf32>
      %151 = arith.addf %150, %149 : vector<8x1xf32>
      %152 = math.log %151 : vector<8x1xf32>
      %153 = arith.addf %145, %152 : vector<8x1xf32>
      %cst_85 = arith.constant 1.000000e+02 : f32
      %154 = vector.broadcast %cst_85 : f32 to vector<8x1xf32>
      %155 = arith.minimumf %153, %154 : vector<8x1xf32>
      %cst_86 = arith.constant 0.000000e+00 : f32
      %156 = vector.broadcast %cst_86 : f32 to vector<8x1xf32>
      %157 = arith.cmpf ole, %143, %156 : vector<8x1xf32>
      %158 = arith.extui %157 : vector<8x1xi1> to vector<8x1xi32>
      %159 = arith.sitofp %158 : vector<8x1xi32> to vector<8x1xf32>
      %cst_87 = arith.constant 0.000000e+00 : f32
      %160 = vector.broadcast %cst_87 : f32 to vector<8x1xf32>
      %161 = arith.select %44, %155, %160 : vector<8x1xi1>, vector<8x1xf32>
      %cst_88 = arith.constant 0.000000e+00 : f32
      %162 = vector.broadcast %cst_88 : f32 to vector<8x1xf32>
      %163 = arith.select %44, %159, %162 : vector<8x1xi1>, vector<8x1xf32>
      %cst_89 = arith.constant dense<0.000000e+00> : vector<1xf32>
      %164 = vector.multi_reduction <add>, %161, %cst_89 [0] : vector<8x1xf32> to vector<1xf32>
      %165 = vector.shape_cast %164 : vector<1xf32> to vector<1x1xf32>
      %166 = arith.addf %125, %165 : vector<1x1xf32>
      %cst_90 = arith.constant dense<0.000000e+00> : vector<1xf32>
      %167 = vector.multi_reduction <add>, %163, %cst_90 [0] : vector<8x1xf32> to vector<1xf32>
      %168 = vector.shape_cast %167 : vector<1xf32> to vector<1x1xf32>
      %169 = arith.addf %128, %168 : vector<1x1xf32>
      %c1_91 = arith.constant 1 : index
      %c0_92 = arith.constant 0 : index
      %c0_93 = arith.constant 0 : index
      %170 = vector.load %arg14[%c1_91, %c0_92, %c0_93] : memref<2x8x128xf32, #tpu.memory_space<vmem>>, vector<1x8x128xf32>
      %171 = vector.shape_cast %170 : vector<1x8x128xf32> to vector<8x128xf32>
      %c1_94 = arith.constant 1 : index
      %c0_95 = arith.constant 0 : index
      %c0_96 = arith.constant 0 : index
      %172 = vector.load %arg15[%c1_94, %c0_95, %c0_96] : memref<2x8x128xf32, #tpu.memory_space<vmem>>, vector<1x8x128xf32>
      %173 = vector.shape_cast %172 : vector<1x8x128xf32> to vector<8x128xf32>
      %174 = arith.addf %171, %173 : vector<8x128xf32>
      %cst_97 = arith.constant 0.000000e+00 : f32
      %cst_98 = arith.constant 6.000000e+00 : f32
      %175 = vector.broadcast %cst_97 : f32 to vector<8x128xf32>
      %176 = arith.maximumf %175, %174 : vector<8x128xf32>
      %177 = vector.broadcast %cst_98 : f32 to vector<8x128xf32>
      %178 = arith.minimumf %177, %176 : vector<8x128xf32>
      %179 = vector.broadcast %77 : vector<1x128xf32> to vector<8x128xf32>
      %180 = arith.mulf %178, %179 : vector<8x128xf32>
      %cst_99 = arith.constant dense<0.000000e+00> : vector<8x128xf32>
      %181 = tpu.matmul %180, %83, %cst_99 {dimension_numbers = #tpu.dot_dimension_numbers<[1], [0], [0], [1], [0, 0, 1, 1], [], []>} : vector<8x128xf32>, vector<128x128xf32>, vector<8x128xf32> -> vector<8x128xf32>
      %182 = vector.extract_strided_slice %181 {offsets = [0, 0], sizes = [8, 1], strides = [1, 1]} : vector<8x128xf32> to vector<8x1xf32>
      %183 = vector.broadcast %82 : vector<1x1xf32> to vector<8x1xf32>
      %184 = arith.addf %182, %183 : vector<8x1xf32>
      %cst_100 = arith.constant 0.000000e+00 : f32
      %185 = vector.broadcast %cst_100 : f32 to vector<8x1xf32>
      %186 = arith.subf %185, %184 : vector<8x1xf32>
      %cst_101 = arith.constant 0.000000e+00 : f32
      %187 = vector.broadcast %cst_101 : f32 to vector<8x1xf32>
      %188 = arith.maximumf %186, %187 : vector<8x1xf32>
      %189 = math.absf %186 : vector<8x1xf32>
      %cst_102 = arith.constant 0.000000e+00 : f32
      %190 = vector.broadcast %cst_102 : f32 to vector<8x1xf32>
      %191 = arith.subf %190, %189 : vector<8x1xf32>
      %192 = math.exp %191 : vector<8x1xf32>
      %cst_103 = arith.constant 1.000000e+00 : f32
      %193 = vector.broadcast %cst_103 : f32 to vector<8x1xf32>
      %194 = arith.addf %193, %192 : vector<8x1xf32>
      %195 = math.log %194 : vector<8x1xf32>
      %196 = arith.addf %188, %195 : vector<8x1xf32>
      %cst_104 = arith.constant 1.000000e+02 : f32
      %197 = vector.broadcast %cst_104 : f32 to vector<8x1xf32>
      %198 = arith.minimumf %196, %197 : vector<8x1xf32>
      %cst_105 = arith.constant 0.000000e+00 : f32
      %199 = vector.broadcast %cst_105 : f32 to vector<8x1xf32>
      %200 = arith.cmpf ogt, %184, %199 : vector<8x1xf32>
      %201 = arith.extui %200 : vector<8x1xi1> to vector<8x1xi32>
      %202 = arith.sitofp %201 : vector<8x1xi32> to vector<8x1xf32>
      %cst_106 = arith.constant 0.000000e+00 : f32
      %203 = vector.broadcast %cst_106 : f32 to vector<8x1xf32>
      %204 = arith.select %44, %198, %203 : vector<8x1xi1>, vector<8x1xf32>
      %cst_107 = arith.constant 0.000000e+00 : f32
      %205 = vector.broadcast %cst_107 : f32 to vector<8x1xf32>
      %206 = arith.select %44, %202, %205 : vector<8x1xi1>, vector<8x1xf32>
      %cst_108 = arith.constant dense<0.000000e+00> : vector<1xf32>
      %207 = vector.multi_reduction <add>, %204, %cst_108 [0] : vector<8x1xf32> to vector<1xf32>
      %208 = vector.shape_cast %207 : vector<1xf32> to vector<1x1xf32>
      %209 = arith.addf %166, %208 : vector<1x1xf32>
      %cst_109 = arith.constant dense<0.000000e+00> : vector<1xf32>
      %210 = vector.multi_reduction <add>, %206, %cst_109 [0] : vector<8x1xf32> to vector<1xf32>
      %211 = vector.shape_cast %210 : vector<1xf32> to vector<1x1xf32>
      %212 = arith.addf %169, %211 : vector<1x1xf32>
      %c1_110 = arith.constant 1 : index
      %c0_111 = arith.constant 0 : index
      %c0_112 = arith.constant 0 : index
      %213 = vector.load %arg14[%c1_110, %c0_111, %c0_112] : memref<2x8x128xf32, #tpu.memory_space<vmem>>, vector<1x8x128xf32>
      %214 = vector.shape_cast %213 : vector<1x8x128xf32> to vector<8x128xf32>
      %c0_113 = arith.constant 0 : index
      %c0_114 = arith.constant 0 : index
      %c0_115 = arith.constant 0 : index
      %215 = vector.load %arg15[%c0_113, %c0_114, %c0_115] : memref<2x8x128xf32, #tpu.memory_space<vmem>>, vector<1x8x128xf32>
      %216 = vector.shape_cast %215 : vector<1x8x128xf32> to vector<8x128xf32>
      %217 = arith.addf %214, %216 : vector<8x128xf32>
      %cst_116 = arith.constant 0.000000e+00 : f32
      %cst_117 = arith.constant 6.000000e+00 : f32
      %218 = vector.broadcast %cst_116 : f32 to vector<8x128xf32>
      %219 = arith.maximumf %218, %217 : vector<8x128xf32>
      %220 = vector.broadcast %cst_117 : f32 to vector<8x128xf32>
      %221 = arith.minimumf %220, %219 : vector<8x128xf32>
      %222 = vector.broadcast %77 : vector<1x128xf32> to vector<8x128xf32>
      %223 = arith.mulf %221, %222 : vector<8x128xf32>
      %cst_118 = arith.constant dense<0.000000e+00> : vector<8x128xf32>
      %224 = tpu.matmul %223, %83, %cst_118 {dimension_numbers = #tpu.dot_dimension_numbers<[1], [0], [0], [1], [0, 0, 1, 1], [], []>} : vector<8x128xf32>, vector<128x128xf32>, vector<8x128xf32> -> vector<8x128xf32>
      %225 = vector.extract_strided_slice %224 {offsets = [0, 0], sizes = [8, 1], strides = [1, 1]} : vector<8x128xf32> to vector<8x1xf32>
      %226 = vector.broadcast %82 : vector<1x1xf32> to vector<8x1xf32>
      %227 = arith.addf %225, %226 : vector<8x1xf32>
      %cst_119 = arith.constant 0.000000e+00 : f32
      %228 = vector.broadcast %cst_119 : f32 to vector<8x1xf32>
      %229 = arith.maximumf %227, %228 : vector<8x1xf32>
      %230 = math.absf %227 : vector<8x1xf32>
      %cst_120 = arith.constant 0.000000e+00 : f32
      %231 = vector.broadcast %cst_120 : f32 to vector<8x1xf32>
      %232 = arith.subf %231, %230 : vector<8x1xf32>
      %233 = math.exp %232 : vector<8x1xf32>
      %cst_121 = arith.constant 1.000000e+00 : f32
      %234 = vector.broadcast %cst_121 : f32 to vector<8x1xf32>
      %235 = arith.addf %234, %233 : vector<8x1xf32>
      %236 = math.log %235 : vector<8x1xf32>
      %237 = arith.addf %229, %236 : vector<8x1xf32>
      %cst_122 = arith.constant 1.000000e+02 : f32
      %238 = vector.broadcast %cst_122 : f32 to vector<8x1xf32>
      %239 = arith.minimumf %237, %238 : vector<8x1xf32>
      %cst_123 = arith.constant 0.000000e+00 : f32
      %240 = vector.broadcast %cst_123 : f32 to vector<8x1xf32>
      %241 = arith.cmpf ole, %227, %240 : vector<8x1xf32>
      %242 = arith.extui %241 : vector<8x1xi1> to vector<8x1xi32>
      %243 = arith.sitofp %242 : vector<8x1xi32> to vector<8x1xf32>
      %cst_124 = arith.constant 0.000000e+00 : f32
      %244 = vector.broadcast %cst_124 : f32 to vector<8x1xf32>
      %245 = arith.select %44, %239, %244 : vector<8x1xi1>, vector<8x1xf32>
      %cst_125 = arith.constant 0.000000e+00 : f32
      %246 = vector.broadcast %cst_125 : f32 to vector<8x1xf32>
      %247 = arith.select %44, %243, %246 : vector<8x1xi1>, vector<8x1xf32>
      %cst_126 = arith.constant dense<0.000000e+00> : vector<1xf32>
      %248 = vector.multi_reduction <add>, %245, %cst_126 [0] : vector<8x1xf32> to vector<1xf32>
      %249 = vector.shape_cast %248 : vector<1xf32> to vector<1x1xf32>
      %250 = arith.addf %209, %249 : vector<1x1xf32>
      %cst_127 = arith.constant dense<0.000000e+00> : vector<1xf32>
      %251 = vector.multi_reduction <add>, %247, %cst_127 [0] : vector<8x1xf32> to vector<1xf32>
      %252 = vector.shape_cast %251 : vector<1xf32> to vector<1x1xf32>
      %253 = arith.addf %212, %252 : vector<1x1xf32>
      %c0_128 = arith.constant 0 : index
      %c0_129 = arith.constant 0 : index
      %254 = vector.load %arg13[%c0_128, %c0_129] : memref<1x2xf32, #tpu.memory_space<vmem>>, vector<1x1xf32>
      %cst_130 = arith.constant 1.250000e-01 : f32
      %255 = vector.broadcast %cst_130 : f32 to vector<1x1xf32>
      %256 = arith.mulf %250, %255 : vector<1x1xf32>
      %257 = arith.addf %254, %256 : vector<1x1xf32>
      %c0_131 = arith.constant 0 : index
      %c0_132 = arith.constant 0 : index
      %258 = vector.load %arg13[%c0_131, %c0_132] : memref<1x2xf32, #tpu.memory_space<vmem>>, vector<1x1xf32>
      tpu.vector_store %arg13[%c0_131, %c0_132], %257 {strides = array<i32>} : memref<1x2xf32, #tpu.memory_space<vmem>>, vector<1x1xf32>,
      %c0_133 = arith.constant 0 : index
      %c1_134 = arith.constant 1 : index
      %259 = vector.load %arg13[%c0_133, %c1_134] : memref<1x2xf32, #tpu.memory_space<vmem>>, vector<1x1xf32>
      %cst_135 = arith.constant 1.250000e-01 : f32
      %260 = vector.broadcast %cst_135 : f32 to vector<1x1xf32>
      %261 = arith.mulf %253, %260 : vector<1x1xf32>
      %262 = arith.addf %259, %261 : vector<1x1xf32>
      %c0_136 = arith.constant 0 : index
      %c1_137 = arith.constant 1 : index
      %263 = vector.load %arg13[%c0_136, %c1_137] : memref<1x2xf32, #tpu.memory_space<vmem>>, vector<1x1xf32>
      tpu.vector_store %arg13[%c0_136, %c1_137], %262 {strides = array<i32>} : memref<1x2xf32, #tpu.memory_space<vmem>>, vector<1x1xf32>,
    } else {
    }
    return
  }
  func.func @transform_0(%arg0: i32, %arg1: i32) -> (i32, i32) {
    %c0_i32 = arith.constant 0 : i32
    %c0_i32_0 = arith.constant 0 : i32
    %c0_i32_1 = arith.constant 0 : i32
    return %c0_i32, %c0_i32_0 : i32, i32
  }
  func.func @transform_1(%arg0: i32, %arg1: i32) -> (i32, i32) {
    %c0_i32 = arith.constant 0 : i32
    %c0_i32_0 = arith.constant 0 : i32
    %c0_i32_1 = arith.constant 0 : i32
    return %c0_i32, %c0_i32_0 : i32, i32
  }
  func.func @transform_2(%arg0: i32, %arg1: i32) -> (i32, i32) {
    %c0_i32 = arith.constant 0 : i32
    %c0_i32_0 = arith.constant 0 : i32
    %c0_i32_1 = arith.constant 0 : i32
    return %c0_i32, %c0_i32_0 : i32, i32
  }
  func.func @transform_3(%arg0: i32, %arg1: i32) -> (i32, i32) {
    %c0_i32 = arith.constant 0 : i32
    %c0_i32_0 = arith.constant 0 : i32
    %c0_i32_1 = arith.constant 0 : i32
    return %c0_i32, %c0_i32_0 : i32, i32
  }
  func.func @transform_4(%arg0: i32, %arg1: i32) -> (i32, i32) {
    %c0_i32 = arith.constant 0 : i32
    %c0_i32_0 = arith.constant 0 : i32
    %c0_i32_1 = arith.constant 0 : i32
    return %c0_i32, %c0_i32_0 : i32, i32
  }
  func.func @transform_5(%arg0: i32, %arg1: i32) -> (i32, i32) {
    %c0_i32 = arith.constant 0 : i32
    %c0_i32_0 = arith.constant 0 : i32
    %c0_i32_1 = arith.constant 0 : i32
    return %c0_i32, %c0_i32_0 : i32, i32
  }
  func.func @transform_6(%arg0: i32, %arg1: i32) -> (i32, i32) {
    %c0_i32 = arith.constant 0 : i32
    %c0_i32_0 = arith.constant 0 : i32
    %c0_i32_1 = arith.constant 0 : i32
    return %c0_i32, %c0_i32_0 : i32, i32
  }
  func.func @transform_7(%arg0: i32, %arg1: i32) -> (i32, i32) {
    %c0_i32 = arith.constant 0 : i32
    %c0_i32_0 = arith.constant 0 : i32
    %c0_i32_1 = arith.constant 0 : i32
    return %c0_i32, %c0_i32_0 : i32, i32
  }
  func.func @transform_8(%arg0: i32, %arg1: i32) -> (i32, i32) {
    %c0_i32 = arith.constant 0 : i32
    %c0_i32_0 = arith.constant 0 : i32
    %c0_i32_1 = arith.constant 0 : i32
    return %c0_i32, %c0_i32_0 : i32, i32
  }
  func.func @transform_9(%arg0: i32, %arg1: i32) -> (i32, i32) {
    %c0_i32 = arith.constant 0 : i32
    %c0_i32_0 = arith.constant 0 : i32
    %c0_i32_1 = arith.constant 0 : i32
    return %c0_i32, %c0_i32_0 : i32, i32
  }
  func.func @transform_10(%arg0: i32, %arg1: i32) -> (i32, i32) {
    %c0_i32 = arith.constant 0 : i32
    %c0_i32_0 = arith.constant 0 : i32
    %c0_i32_1 = arith.constant 0 : i32
    return %c0_i32, %c0_i32_0 : i32, i32
  }
  func.func @transform_11(%arg0: i32, %arg1: i32) -> (i32, i32) {
    %c0_i32 = arith.constant 0 : i32
    %c0_i32_0 = arith.constant 0 : i32
    %c0_i32_1 = arith.constant 0 : i32
    return %c0_i32, %c0_i32_0 : i32, i32
  }
}

</mosaic_0001>

<bundles_post_ra>
// kernel: loss_style_forward.1
= control target key start
LH: loop header
LB: loop body
LE: loop exit
PB: predicated region body
PF: predicated region fallthrough
CT: control target
= control target key end

     0   :  { %s1725_s19 = smov 0   ;;  %s1727_s20 = smov 0   ;;  %s1961_s0 = inlined_call_operand.vmem [shape: f32[8,32], index: 0, kind: input, shape index: {}]   ;;  %s1962_s1 = inlined_call_operand.vmem [shape: f32[8,32], index: 1, kind: input, shape index: {}]   ;;  %s1963_s2 = inlined_call_operand.vmem [shape: f32[8,32], index: 2, kind: input, shape index: {}]   ;;  %s1964_s3 = inlined_call_operand.vmem [shape: f32[8,32], index: 3, kind: input, shape index: {}]   ;;  %s1965_s4 = inlined_call_operand.vmem [shape: bf16[32,128], index: 4, kind: input, shape index: {}]   ;;  %s1966_s5 = inlined_call_operand.vmem [shape: bf16[32,128], index: 5, kind: input, shape index: {}]   ;;  %s1967_s6 = inlined_call_operand.vmem [shape: f32[1,128], index: 6, kind: input, shape index: {}]   ;;  %s1968_s7 = inlined_call_operand.vmem [shape: f32[1,128], index: 7, kind: input, shape index: {}]   ;;  %s1969_s8 = inlined_call_operand.vmem [shape: f32[1,128], index: 8, kind: input, shape index: {}]   ;;  %s1970_s9 = inlined_call_operand.vmem [shape: f32[1,128], index: 9, kind: input, shape index: {}]   ;;  %s1971_s10 = inlined_call_operand.<no memory space> [shape: f32[1,1], index: 10, kind: input, shape index: {}]   ;;  %s1972_s11 = inlined_call_operand.vmem [shape: f32[1,2], index: 11, kind: output, shape index: {}]  }
   0x1   :  { %v16_v0 = vstv %s1971_s10  ;;  %s1729_s21 = smov 0  }
   0x2   :  { %17 = vst [vmem:[#allocation6] sm:$0x1] %v16_v0 }
   0x3 LB: > { %s35_s10 = sadd.s32 1, %s1648_s20  ;;  %p1233_p0 = scmp.ge.s32.totalorder %s1652_s21, 1  ;;  %s1652_s21 = sphi %s1729_s21, %s23_s21   ;;  %s1648_s20 = sphi %s1727_s20, %s1974_s20   ;;  %s1644_s19 = sphi %s1725_s19, %s1973_s19  }
   0x4   : > { %p37_p1 = scmp.ge.s32.totalorder %s35_s10, 2  ;;  %p336_p2 = scmp.lt.s32.totalorder %s1652_s21, 3 }
   0x6   : > { %s1976_s10 = smov (%p37_p1, %s35_s10), 0  ;;  %p337_p3 = pnand %p1233_p0, %p336_p2 }
   0x7   : > { %v1604_v1 = vld [vmem:[%s1965_s4] sm:$0xff] (!%p337_p3)   ;;  %v1654_v2 = vmov (!%p337_p3), 0.0   ;;  %v1606_v4 = vld [vmem:[%s1965_s4 + $0x8] sm:$0xff] (!%p337_p3)   ;;  %vm1655_vm0 = vmmov (!%p337_p3), 0   ;;  %vm394_vm1 = vcmask (!%p337_p3), 261120   ;;  %v630_v18 = vlaneseq (!%p337_p3)  ;;  %p1247_p4 = scmp.ne.s32.totalorder (!%p337_p3), %s1644_s19, 0 }
   0x8   : > { %340 = sbr.rel (%p337_p3) target bundleno = 698 (0x2ba), region = 64  ;;  %1335 = vmatprep.subr.bf16.mxu0 (!%p337_p3), %v1654_v2  ;;  %1343 = vmatprep.subr.bf16.mxu1 (!%p337_p3), %v1654_v2  ;;  %v1605_v3 = vld [vmem:[%s1965_s4] sm:$0xff] (!%p337_p3)   ;;  %v1607_v5 = vld [vmem:[%s1965_s4 + $0x8] sm:$0xff] (!%p337_p3)  }
   0x9   : > { %1336 = vmatpush3.bf16.msra.mxu0 (!%p337_p3), %v1604_v1  ;;  %1339 = vmatprep.mubr.msk.bf16.mxu0 (!%p337_p3), %vm1655_vm0, %v1654_v2  ;;  %v370_v6 = vld [vmem:[%s1961_s0] sm:$0xff] (!%p337_p3)  ;;  %v1610_v12 = vld [vmem:[%s1966_s5 + $0x8] sm:$0xff] (!%p337_p3)   ;;  %v1789_v19 = vshrl.u32 (!%p337_p3), %v630_v18, 7 }
   0xa   : > { %1344 = vmatpush3.bf16.msra.mxu1 (!%p337_p3), %v1605_v3  ;;  %1337 = vmatprep.subr.bf16.mxu0 (!%p337_p3), %v1654_v2  ;;  %v440_v7 = vld [vmem:[%s1962_s1] sm:$0xff] (!%p337_p3)  ;;  %v371_v8 = vpack.c.bf16 (!%p337_p3), %v370_v6, %v370_v6  ;;  %v1611_v14 = vld [vmem:[%s1966_s5 + $0x8] sm:$0xff] (!%p337_p3)  }
   0xb   : > { %1345 = vmatprep.subr.bf16.mxu1 (!%p337_p3), %v1654_v2  ;;  %1347 = vmatprep.mubr.msk.bf16.mxu1 (!%p337_p3), %vm1655_vm0, %v1654_v2  ;;  %v441_v9 = vpack.c.bf16 (!%p337_p3), %v440_v7, %v440_v7  ;;  %v1608_v10 = vld [vmem:[%s1966_s5] sm:$0xff] (!%p337_p3)   ;;  %vm634_vm2 = vcmp.lt.s32.totalorder (!%p337_p3), %v1789_v19, 2 }
   0xc   : > { %v1609_v11 = vld [vmem:[%s1966_s5] sm:$0xff] (!%p337_p3)  }
   0xd   : > { %1338 = vmatpush3.bf16.msra.mxu0 (!%p337_p3), %v1606_v4  ;;  %v504_v13 = vld [vmem:[%s1963_s2] sm:$0xff] (!%p337_p3) }
   0xe   : > { %1346 = vmatpush3.bf16.msra.mxu1 (!%p337_p3), %v1607_v5  ;;  %1351 = vmatprep.subr.bf16.mxu0 (!%p337_p3), %v1654_v2  ;;  %v567_v15 = vld [vmem:[%s1964_s3] sm:$0xff] (!%p337_p3)  ;;  %v505_v16 = vpack.c.bf16 (!%p337_p3), %v504_v13, %v504_v13 }
   0xf   : > { %1359 = vmatprep.subr.bf16.mxu1 %v1654_v2  ;;  %v568_v17 = vpack.c.bf16 %v567_v15, %v567_v15  ;;  %v1234_v20 = vld [vmem:[%s1967_s6] ss:$0 sm:$0xff] }
  0x10   : > { %1340 = vmatmul.mubr.msk.bf16.vlgmr.msra.gmra.mrb[0].mxu0 %vm394_vm1, %v371_v8 }
  0x11   : > { %1348 = vmatmul.mubr.msk.bf16.vlgmr.msra.gmra.mrb[0].mxu1 %vm394_vm1, %v441_v9  ;;  %1352 = vmatpush3.bf16.msra.mxu0 %v1608_v10 }
  0x12   : > { %1360 = vmatpush3.bf16.msra.mxu1 %v1609_v11  ;;  %1353 = vmatprep.subr.bf16.mxu0 %v1654_v2 }
  0x13   : > { %1361 = vmatprep.subr.bf16.mxu1 %v1654_v2  ;;  %1355 = vmatprep.mubr.msk.bf16.mxu0 %vm1655_vm0, %v1654_v2 }
  0x14   : > { %1363 = vmatprep.mubr.msk.bf16.mxu1 %vm1655_vm0, %v1654_v2 }
  0x15   : > { %1354 = vmatpush3.bf16.msra.mxu0 %v1610_v12 }
  0x16   : > { %1362 = vmatpush3.bf16.msra.mxu1 %v1611_v14 }
  0x18   : > { %1356 = vmatmul.mubr.msk.bf16.vlgmr.msra.gmra.mrb[4].mxu0 %vm394_vm1, %v505_v16 }
  0x19   : > { %1364 = vmatmul.mubr.msk.bf16.vlgmr.msra.gmra.mrb[4].mxu1 %vm394_vm1, %v568_v17 }
  0xe3   : > { %v432_v21 = vpop.f32.mrb[0].mxu0 }
  0xe4   : > { %v433_v22 = vadd.f32 %v1234_v20, %v432_v21  ;;  %v495_v23 = vpop.f32.mrb[0].mxu1  ;;  %v1341_v24 = vpop.f32.mrb[1].mxu0 }
  0xe5   : > { %v496_v25 = vadd.f32 %v1234_v20, %v495_v23  ;;  %v1349_v26 = vpop.f32.mrb[1].mxu1  ;;  %v435_v27 = vpop.f32.mrb[2].mxu0 }
  0xe6   : > { %438 = vst [vmem:[#allocation2] sm:$0xff] %v433_v22  ;;  %v498_v28 = vpop.f32.mrb[2].mxu1  ;;  %v1342_v29 = vpop.f32.mrb[3].mxu0 }
  0xe7   : > { %502 = vst [vmem:[#allocation2 + $0x8] sm:$0xff] %v496_v25  ;;  %v1350_v30 = vpop.f32.mrb[3].mxu1 }
  0xe9   : > { %638 = sbr.rel (%p1247_p4) target bundleno = 261 (0x105), region = 68 }
  0xeb   : > { %v559_v31 = vpop.f32.mrb[4].mxu0 }
  0xec   : > { %565 = vst [vmem:[#allocation3] sm:$0xff] %v559_v31  ;;  %v622_v32 = vpop.f32.mrb[4].mxu1  ;;  %v1357_v33 = vpop.f32.mrb[5].mxu0 }
  0xed   : > { %629 = vst [vmem:[#allocation3 + $0x8] sm:$0xff] %v622_v32  ;;  %v1365_v34 = vpop.f32.mrb[5].mxu1  ;;  %v562_v35 = vpop.f32.mrb[6].mxu0  ;;  %v645_v39 = vld [vmem:[#allocation2] sm:$0xff] (!%p1247_p4) }
  0xee   : > { %v625_v36 = vpop.f32.mrb[6].mxu1  ;;  %v1358_v37 = vpop.f32.mrb[7].mxu0  ;;  %v664_v44 = vld [vmem:[#allocation2 + $0x8] sm:$0xff] (!%p1247_p4) }
  0xef   : > { %v1366_v38 = vpop.f32.mrb[7].mxu1 }
  0xf3   : > { %v646_v40 = vld [vmem:[#allocation3] sm:$0xff] }
  0xf4   : > { %v656_v41 = vld [vmem:[#allocation3 + $0x8] sm:$0xff]  ;;  %v647_v42 = vadd.f32 %v646_v40, %v645_v39  ;;  %v672_v46 = vadd.f32 %v664_v44, %v646_v40 }
  0xf5   : > { %v657_v43 = vadd.f32 %v656_v41, %v645_v39  ;;  %v665_v45 = vadd.f32 %v664_v44, %v656_v41 }
  0xf6   : > { %v648_v47 = vmax.f32 %v647_v42, 0.0  ;;  %v673_v50 = vmax.f32 %v672_v46, 0.0 }
  0xf7   : > { %v658_v48 = vmax.f32 %v657_v43, 0.0  ;;  %v666_v49 = vmax.f32 %v665_v45, 0.0 }
  0xf8   : > { %v649_v51 = vmin.f32 %v648_v47, 6.0  ;;  %v674_v54 = vmin.f32 %v673_v50, 6.0 }
  0xf9   : > { %v659_v52 = vmin.f32 %v658_v48, 6.0  ;;  %v667_v53 = vmin.f32 %v666_v49, 6.0 }
  0xfa   : > { %v652_v55 = vsel %vm634_vm2, %v649_v51, 0.0  ;;  %v675_v59 = vsel %vm634_vm2, %v674_v54, 0.0 }
  0xfb   : > { %v660_v56 = vsel %vm634_vm2, %v659_v52, 0.0  ;;  %v668_v58 = vsel %vm634_vm2, %v667_v53, 0.0  ;;  %v654_v60 = vmul.f32 %v652_v55, %v652_v55  ;;  %v677_v1 = vmul.f32 %v675_v59, %v675_v59 }
  0xfc   : > { %v661_v57 = vadd.f32 %v660_v56, %v652_v55  ;;  %v662_v61 = vmul.f32 %v660_v56, %v660_v56  ;;  %v670_v62 = vmul.f32 %v668_v58, %v668_v58 }
  0xfe   : > { %v669_v63 = vadd.f32 %v668_v58, %v661_v57  ;;  %v663_v0 = vadd.f32 %v662_v61, %v654_v60 }
 0x100   : > { %v676_v2 = vadd.f32 %v675_v59, %v669_v63  ;;  %v671_v3 = vadd.f32 %v670_v62, %v663_v0 }
 0x102   : > { %v678_v4 = vadd.f32 %v677_v1, %v671_v3  ;;  %681 = vst [vmem:[#allocation4] sm:$0xff] %v676_v2 }
 0x104   : > { %684 = vst [vmem:[#allocation5] sm:$0xff] %v678_v4 }
 0x105 PF: > { %p1248_p5 = scmp.ne.s32.totalorder %s1644_s19, 1 }
 0x106   : > { %v1656_v6 = vmov (!%p1248_p5), 0.0|0.0   ;;  %v1657_v9 = vmov (!%p1248_p5), 1.0|1.0   ;;  %vm1658_vm3 = vmmov (!%p1248_p5), 0   ;;  %v1659_v12 = vmov (!%p1248_p5), 0.0   ;;  %v730_v29 = vld [vmem:[#allocation2] sm:$0xff] (!%p1248_p5) }
 0x107   : > { %688 = sbr.rel (%p1248_p5) target bundleno = 698 (0x2ba), region = 76  ;;  %1507 = vmatprep.subr.bf16.mxu0 (!%p1248_p5), %v1656_v6  ;;  %1523 = vmatprep.subr.bf16.mxu1 (!%p1248_p5), %v1656_v6  ;;  %v716_v34 = vld [vmem:[%s1968_s7] sm:$0x1] (!%p1248_p5)  ;;  %v738_v40 = vsub.s32 (!%p1248_p5), 0, %v1789_v19  ;;  %vm724_vm4 = vcmask (!%p1248_p5), 1040384   ;;  %v957_v52 = vld [vmem:[#allocation2 + $0x8] sm:$0xff] (!%p1248_p5) }
 0x108   : > { %1508 = vmatpush3.bf16.msra.mxu0 (!%p1248_p5), %v1657_v9  ;;  %1524 = vmatpush3.bf16.msra.mxu1 (!%p1248_p5), %v1657_v9  ;;  %v731_v30 = vld [vmem:[#allocation3] sm:$0xff] (!%p1248_p5)  ;;  %v721_v38 = vld [vmem:[%s1970_s9] sm:$0x1] (!%p1248_p5)  ;;  %vm693_vm5 = vcmask (!%p1248_p5), 8192   ;;  %vm833_vm7 = vcmask (!%p1248_p5), 7168   ;;  %s1661_s23 = smov (!%p1248_p5), 1  }
 0x109   : > { %v695_v5 = vld [vmem:[#allocation4] sm:$0xff] (!%p1248_p5)  ;;  %1509 = vmatprep.subr.bf16.mxu0 (!%p1248_p5), %v1656_v6  ;;  %1525 = vmatprep.subr.bf16.mxu1 (!%p1248_p5), %v1656_v6  ;;  %v850_v31 = vld [vmem:[#allocation3 + $0x8] sm:$0xff] (!%p1248_p5)  ;;  %v732_v32 = vadd.f32 (!%p1248_p5), %v731_v30, %v730_v29  ;;  %v1065_v53 = vadd.f32 (!%p1248_p5), %v957_v52, %v731_v30  ;;  %694 = vst.msk [vmem:[%s1972_s11] sm:$0x1] (!%p1248_p5), %vm693_vm5, %v1659_v12  ;;  %v728_v61 = vld [vmem:[#allocation6] sm:$0x1] (!%p1248_p5) }
 0x10a   : > { %v696_v7 = vrot.slane (!%p1248_p5), %v695_v5, 4  ;;  %1399 = vmatprep.mubr.msk.f32.mxu0 (!%p1248_p5), %vm1658_vm3, %v1659_v12  ;;  %1434 = vmatprep.mubr.msk.f32.mxu1 (!%p1248_p5), %vm1658_vm3, %v1659_v12  ;;  %v851_v33 = vadd.f32 (!%p1248_p5), %v850_v31, %v730_v29  ;;  %v718_v41 = vld [vmem:[%s1969_s8] sm:$0x1] (!%p1248_p5)  ;;  %v958_v54 = vadd.f32 (!%p1248_p5), %v957_v52, %v850_v31  ;;  %vm1174_vm11 = vcmask (!%p1248_p5), 0  }
 0x10b   : > { %v703_v8 = vld [vmem:[#allocation5] sm:$0xff] (!%p1248_p5)  ;;  %v733_v35 = vmax.f32 (!%p1248_p5), %v732_v32, 0.0  ;;  %v1066_v55 = vmax.f32 (!%p1248_p5), %v1065_v53, 0.0  ;;  %vm1197_vm12 = vcmask (!%p1248_p5), 8200  }
 0x10c   : > { %v704_v10 = vrot.slane (!%p1248_p5), %v703_v8, 4  ;;  %v697_v11 = vadd.f32 (!%p1248_p5), %v696_v7, %v695_v5  ;;  %1510 = vmatpush3.bf16.msra.mxu0 (!%p1248_p5), %v1657_v9  ;;  %1526 = vmatpush3.bf16.msra.mxu1 (!%p1248_p5), %v1657_v9  ;;  %v852_v36 = vmax.f32 (!%p1248_p5), %v851_v33, 0.0  ;;  %v959_v56 = vmax.f32 (!%p1248_p5), %v958_v54, 0.0 }
 0x10d   : > { %1511 = vmatprep.subr.bf16.mxu0 (!%p1248_p5), %v1656_v6  ;;  %1527 = vmatprep.subr.bf16.mxu1 (!%p1248_p5), %v1656_v6  ;;  %v734_v43 = vmin.f32 (!%p1248_p5), %v733_v35, 6.0  ;;  %v1067_v58 = vmin.f32 (!%p1248_p5), %v1066_v55, 6.0 }
 0x10e   : > { %v705_v13 = vadd.f32 %v704_v10, %v703_v8  ;;  %v698_v14 = vrot.slane %v697_v11, 2  ;;  %v853_v44 = vmin.f32 %v852_v36, 6.0  ;;  %v960_v57 = vmin.f32 %v959_v56, 6.0 }
 0x110   : > { %v706_v15 = vrot.slane %v705_v13, 2  ;;  %v699_v16 = vadd.f32 %v698_v14, %v697_v11  ;;  %1512 = vmatpush3.bf16.msra.mxu0 %v1657_v9  ;;  %1528 = vmatpush3.bf16.msra.mxu1 %v1657_v9 }
 0x111   : > { %1513 = vmatprep.subr.bf16.mxu0 %v1656_v6  ;;  %1529 = vmatprep.subr.bf16.mxu1 %v1656_v6 }
 0x112   : > { %v707_v17 = vadd.f32 %v706_v15, %v705_v13  ;;  %v700_v18 = vrot.slane %v699_v16, 1 }
 0x114   : > { %v708_v20 = vrot.slane %v707_v17, 1  ;;  %v701_v21 = vadd.f32 %v700_v18, %v699_v16  ;;  %1514 = vmatpush3.bf16.msra.mxu0 %v1657_v9  ;;  %1530 = vmatpush3.bf16.msra.mxu1 %v1657_v9 }
 0x115   : > { %1515 = vmatprep.subr.bf16.mxu0 %v1656_v6  ;;  %1531 = vmatprep.subr.bf16.mxu1 %v1656_v6 }
 0x116   : > { %v709_v22 = vadd.f32 %v708_v20, %v707_v17  ;;  %v702_v23 = vmul.f32 0.125, %v701_v21 }
 0x118   : > { %v710_v24 = vmul.f32 0.125, %v709_v22  ;;  %v711_v25 = vmul.f32 %v702_v23, %v702_v23  ;;  %1516 = vmatpush3.bf16.msra.mxu0 %v1657_v9  ;;  %1532 = vmatpush3.bf16.msra.mxu1 %v1657_v9 }
 0x119   : > { %1517 = vmatprep.subr.bf16.mxu0 %v1656_v6  ;;  %1533 = vmatprep.subr.bf16.mxu1 %v1656_v6 }
 0x11a   : > { %v712_v26 = vsub.f32 %v710_v24, %v711_v25 }
 0x11c   : > { %v713_v27 = vmax.f32 %v712_v26, 0.0  ;;  %1518 = vmatpush3.bf16.msra.mxu0 %v1657_v9  ;;  %1534 = vmatpush3.bf16.msra.mxu1 %v1657_v9 }
 0x11d   : > { %1519 = vmatprep.subr.bf16.mxu0 %v1656_v6  ;;  %1535 = vmatprep.subr.bf16.mxu1 %v1656_v6 }
 0x11e   : > { %v714_v28 = vadd.f32 1e-05, %v713_v27 }
 0x120   : > { %1612 = vrsqrt.f32 %v714_v28  ;;  %1520 = vmatpush3.bf16.msra.mxu0 %v1657_v9  ;;  %1536 = vmatpush3.bf16.msra.mxu1 %v1657_v9 }
 0x121   : > { %1521 = vmatprep.subr.bf16.mxu0 %v1656_v6  ;;  %1537 = vmatprep.subr.bf16.mxu1 %v1656_v6 }
 0x124   : > { %1522 = vmatpush3.bf16.msra.mxu0 %v1657_v9  ;;  %1538 = vmatpush3.bf16.msra.mxu1 %v1657_v9 }
 0x125   : > { %1539 = vmatprep.subr.bf16.mxu0 %v1656_v6  ;;  %1555 = vmatprep.subr.bf16.mxu1 %v1656_v6 }
 0x12a   : > { %v1613_v37 = vpop.eup %1612 }
 0x12b   : > { %v717_v39 = vmul.f32 %v1613_v37, %v716_v34 }
 0x12d   : > { %v722_v42 = vmul.f32 %v721_v38, %v717_v39  ;;  %v719_v45 = vmul.f32 %v717_v39, %v702_v23 }
 0x12f   : > { %v739_v46 = vrot.slane %v722_v42, %v738_v40  ;;  %v720_v47 = vsub.f32 %v718_v41, %v719_v45 }
 0x131   : > { %v741_v48 = vmul.f32 %v739_v46, %v734_v43  ;;  %v854_v49 = vmul.f32 %v853_v44, %v739_v46  ;;  %v723_v50 = vmul.f32 %v721_v38, %v720_v47  ;;  %v961_v59 = vmul.f32 %v960_v57, %v739_v46 }
 0x132   : > { %v1068_v60 = vmul.f32 %v1067_v58, %v739_v46 }
 0x133   : > { %1400 = vmatmul.mubr.f32.vlgmr.msra.gmra.mrb[0].mxu0 %v741_v48  ;;  %1435 = vmatmul.mubr.f32.vlgmr.msra.gmra.mrb[0].mxu1 %v854_v49  ;;  %v725_v51 = vsel %vm724_vm4, %v723_v50, 0.0 }
 0x134   : > { %1540 = vmatpush3.bf16.msra.mxu0 %v1657_v9  ;;  %1556 = vmatpush3.bf16.msra.mxu1 %v1657_v9 }
 0x135   : > { %1541 = vmatprep.subr.bf16.mxu0 %v1656_v6  ;;  %1557 = vmatprep.subr.bf16.mxu1 %v1656_v6 }
 0x136   : > { %1469 = vmatprep.mubr.msk.f32.mxu0 %vm1658_vm3, %v1659_v12  ;;  %1504 = vmatprep.mubr.msk.f32.mxu1 %vm1658_vm3, %v1659_v12 }
 0x137   : > { %726 = vadd.xlane.f32.xlu0 %v725_v51 }
 0x138   : > { %1542 = vmatpush3.bf16.msra.mxu0 %v1657_v9  ;;  %1558 = vmatpush3.bf16.msra.mxu1 %v1657_v9 }
 0x139   : > { %1543 = vmatprep.subr.bf16.mxu0 %v1656_v6  ;;  %1559 = vmatprep.subr.bf16.mxu1 %v1656_v6 }
 0x13c   : > { %1544 = vmatpush3.bf16.msra.mxu0 %v1657_v9  ;;  %1560 = vmatpush3.bf16.msra.mxu1 %v1657_v9 }
 0x13d   : > { %1545 = vmatprep.subr.bf16.mxu0 %v1656_v6  ;;  %1561 = vmatprep.subr.bf16.mxu1 %v1656_v6 }
 0x140   : > { %1546 = vmatpush3.bf16.msra.mxu0 %v1657_v9  ;;  %1562 = vmatpush3.bf16.msra.mxu1 %v1657_v9 }
 0x141   : > { %1547 = vmatprep.subr.bf16.mxu0 %v1656_v6  ;;  %1563 = vmatprep.subr.bf16.mxu1 %v1656_v6 }
 0x144   : > { %1548 = vmatpush3.bf16.msra.mxu0 %v1657_v9  ;;  %1564 = vmatpush3.bf16.msra.mxu1 %v1657_v9 }
 0x145   : > { %1549 = vmatprep.subr.bf16.mxu0 %v1656_v6  ;;  %1565 = vmatprep.subr.bf16.mxu1 %v1656_v6 }
 0x148   : > { %1550 = vmatpush3.bf16.msra.mxu0 %v1657_v9  ;;  %1566 = vmatpush3.bf16.msra.mxu1 %v1657_v9 }
 0x149   : > { %1551 = vmatprep.subr.bf16.mxu0 %v1656_v6  ;;  %1567 = vmatprep.subr.bf16.mxu1 %v1656_v6 }
 0x14c   : > { %1552 = vmatpush3.bf16.msra.mxu0 %v1657_v9  ;;  %1568 = vmatpush3.bf16.msra.mxu1 %v1657_v9 }
 0x14d   : > { %1553 = vmatprep.subr.bf16.mxu0 %v1656_v6  ;;  %1569 = vmatprep.subr.bf16.mxu1 %v1656_v6 }
 0x150   : > { %1554 = vmatpush3.bf16.msra.mxu0 %v1657_v9  ;;  %1570 = vmatpush3.bf16.msra.mxu1 %v1657_v9 }
 0x153   : > { %1470 = vmatmul.mubr.f32.vlgmr.msra.gmra.mrb[2].mxu0 %v961_v59  ;;  %1505 = vmatmul.mubr.f32.vlgmr.msra.gmra.mrb[2].mxu1 %v1068_v60 }
 0x1c4   : > { %v727_v62 = vpop.xlane.xlu0 %726 }
 0x1c5   : > { %v729_v63 = vadd.f32 %v728_v61, %v727_v62 }
 0x1c7   : > { %v815_v0 = vrot.slane %v729_v63, %v738_v40 }
 0x206   : > { %v808_v1 = vpop.f32.mrb[0].mxu0  ;;  %v921_v2 = vpop.f32.mrb[0].mxu1 }
 0x207   : > { %v816_v3 = vadd.f32 %v815_v0, %v808_v1  ;;  %v925_v4 = vadd.f32 %v921_v2, %v815_v0  ;;  %v1401_v5 = vpop.f32.mrb[1].mxu0  ;;  %v1436_v6 = vpop.f32.mrb[1].mxu1 }
 0x209   : > { %v817_v7 = vsub.f32 0.0, %v816_v3  ;;  %vm828_vm6 = vcmp.gt.f32.partialorder %v816_v3, 0.0  ;;  %v927_v8 = vand.u32 2147483647, %v925_v4  ;;  %vm936_vm8 = vcmp.le.f32.partialorder %v925_v4, 0.0 }
 0x20a   : > { %v1249_v9 = vsel %vm828_vm6, 1.0, %v1659_v12  ;;  %v1250_v15 = vsel %vm936_vm8, 1.0, %v1659_v12  ;;  %v926_v42 = vmax.f32 %v925_v4, 0.0 }
 0x20b   : > { %v819_v10 = vand.u32 2147483647, %v817_v7  ;;  %v832_v11 = vsel %vm634_vm2, %v1249_v9, 0.0  ;;  %v928_v13 = vsub.f32 0.0, %v927_v8  ;;  %v940_v20 = vsel %vm634_vm2, %v1250_v15, 0.0 }
 0x20c   : > { %v842_v14 = vsel %vm833_vm7, %v832_v11, 0.0  ;;  %v949_v21 = vsel %vm833_vm7, %v940_v20, 0.0  ;;  %v818_v49 = vmax.f32 %v817_v7, 0.0 }
 0x20d   : > { %v820_v16 = vsub.f32 0.0, %v819_v10  ;;  %v843_v17 = vrot.slane %v842_v14, 4  ;;  %v929_v18 = vmul.f32 1.442695, %v928_v13  ;;  %v950_v24 = vrot.slane %v949_v21, 4 }
 0x20f   : > { %v821_v22 = vmul.f32 1.442695, %v820_v16  ;;  %v844_v23 = vadd.f32 %v843_v17, %v842_v14  ;;  %1614 = vpow2.f32 %v929_v18  ;;  %v951_v26 = vadd.f32 %v950_v24, %v949_v21 }
 0x210   : > { %v1660_v21 = vmov 1966171168  }
 0x211   : > { %1616 = vpow2.f32 %v821_v22  ;;  %v845_v25 = vrot.slane %v844_v23, 2  ;;  %v952_v28 = vrot.slane %v951_v26, 2  ;;  %v1180_v22 = vunpack.c.l.s4 %v1660_v21 }
 0x213   : > { %v846_v27 = vadd.f32 %v845_v25, %v844_v23  ;;  %v953_v30 = vadd.f32 %v952_v28, %v951_v26 }
 0x215   : > { %v847_v29 = vrot.slane %v846_v27, 1  ;;  %v954_v32 = vrot.slane %v953_v30, 1 }
 0x217   : > { %v848_v31 = vadd.f32 %v847_v29, %v846_v27  ;;  %v955_v34 = vadd.f32 %v954_v32, %v953_v30 }
 0x219   : > { %v1615_v33 = vpop.eup %1614  ;;  %v1903_v37 = vadd.f32 %v955_v34, %v848_v31  ;;  %v1181_v31 = vunpack.c.0.s8 %v1180_v22 }
 0x21a   : > { %v931_v35 = vadd.f32 1.0, %v1615_v33 }
 0x21b   : > { %v1617_v36 = vpop.eup %1616 }
 0x21c   : > { %v823_v38 = vadd.f32 1.0, %v1617_v36  ;;  %1618 = vlog2.f32 %v931_v35 }
 0x21e   : > { %1620 = vlog2.f32 %v823_v38 }
 0x226   : > { %v1619_v39 = vpop.eup %1618  ;;  %v1028_v40 = vpop.f32.mrb[2].mxu0 }
 0x227   : > { %v1135_v41 = vpop.f32.mrb[2].mxu1  ;;  %v933_v43 = vmul.f32 0.6931472, %v1619_v39  ;;  %v1905_v44 = vadd.f32 %v1028_v40, %v815_v0  ;;  %v1471_v46 = vpop.f32.mrb[3].mxu0 }
 0x228   : > { %v1907_v45 = vadd.f32 %v1135_v41, %v815_v0  ;;  %v1506_v47 = vpop.f32.mrb[3].mxu1  ;;  %v1621_v48 = vpop.eup %1620 }
 0x229   : > { %v825_v50 = vmul.f32 0.6931472, %v1621_v48  ;;  %v934_v51 = vadd.f32 %v933_v43, %v926_v42  ;;  %v1033_v52 = vsub.f32 0.0, %v1905_v44  ;;  %vm1044_vm9 = vcmp.gt.f32.partialorder %v1905_v44, 0.0 }
 0x22a   : > { %v1251_v53 = vsel %vm1044_vm9, 1.0, %v1659_v12  ;;  %v1141_v54 = vand.u32 2147483647, %v1907_v45  ;;  %vm1150_vm10 = vcmp.le.f32.partialorder %v1907_v45, 0.0  ;;  %v1184_v43 = vsub.s32 %v1181_v31, %v1789_v19  ;;  %v1171_v19 = vld [vmem:[%s1972_s11] sm:$0x1] }
 0x22b   : > { %v826_v55 = vadd.f32 %v825_v50, %v818_v49  ;;  %v935_v56 = vmin.f32 %v934_v51, 100.0  ;;  %v1035_v57 = vand.u32 2147483647, %v1033_v52  ;;  %v1048_v58 = vsel %vm634_vm2, %v1251_v53, 0.0 }
 0x22c   : > { %v1142_v59 = vsub.f32 0.0, %v1141_v54  ;;  %v1252_v60 = vsel %vm1150_vm10, 1.0, %v1659_v12  ;;  %v1057_v0 = vsel %vm833_vm7, %v1048_v58, 0.0  ;;  %v1034_v54 = vmax.f32 %v1033_v52, 0.0 }
 0x22d   : > { %v827_v61 = vmin.f32 %v826_v55, 100.0  ;;  %v939_v62 = vsel %vm634_vm2, %v935_v56, 0.0  ;;  %v1036_v63 = vsub.f32 0.0, %v1035_v57  ;;  %v1058_v2 = vrot.slane %v1057_v0, 4 }
 0x22e   : > { %v941_v1 = vsel %vm833_vm7, %v939_v62, 0.0  ;;  %v1143_v3 = vmul.f32 1.442695, %v1142_v59  ;;  %v1154_v4 = vsel %vm634_vm2, %v1252_v60, 0.0 }
 0x22f   : > { %v831_v5 = vsel %vm634_vm2, %v827_v61, 0.0  ;;  %v942_v6 = vrot.slane %v941_v1, 4  ;;  %v1037_v7 = vmul.f32 1.442695, %v1036_v63  ;;  %v1163_v12 = vsel %vm833_vm7, %v1154_v4, 0.0 }
 0x230   : > { %v834_v8 = vsel %vm833_vm7, %v831_v5, 0.0  ;;  %v1059_v9 = vadd.f32 %v1058_v2, %v1057_v0  ;;  %1622 = vpow2.f32 %v1143_v3  ;;  %v1164_v10 = vrot.slane %v1163_v12, 4 }
 0x231   : > { %v835_v11 = vrot.slane %v834_v8, 4  ;;  %v943_v13 = vadd.f32 %v942_v6, %v941_v1  ;;  %1624 = vpow2.f32 %v1037_v7 }
 0x232   : > { %v1060_v14 = vrot.slane %v1059_v9, 2  ;;  %v1165_v15 = vadd.f32 %v1164_v10, %v1163_v12 }
 0x233   : > { %v836_v16 = vadd.f32 %v835_v11, %v834_v8  ;;  %v944_v17 = vrot.slane %v943_v13, 2 }
 0x234   : > { %v1061_v18 = vadd.f32 %v1060_v14, %v1059_v9  ;;  %v1166_v20 = vrot.slane %v1165_v15, 2 }
 0x235   : > { %v837_v23 = vrot.slane %v836_v16, 2  ;;  %v945_v24 = vadd.f32 %v944_v17, %v943_v13 }
 0x236   : > { %v1062_v25 = vrot.slane %v1061_v18, 1  ;;  %v1167_v26 = vadd.f32 %v1166_v20, %v1165_v15 }
 0x237   : > { %v838_v27 = vadd.f32 %v837_v23, %v836_v16  ;;  %v946_v28 = vrot.slane %v945_v24, 1 }
 0x238   : > { %v1063_v29 = vadd.f32 %v1062_v25, %v1061_v18  ;;  %v1168_v30 = vrot.slane %v1167_v26, 1 }
 0x239   : > { %v839_v32 = vrot.slane %v838_v27, 1  ;;  %v947_v39 = vadd.f32 %v946_v28, %v945_v24 }
 0x23a   : > { %v1623_v33 = vpop.eup %1622  ;;  %v1064_v34 = vadd.f32 %v1063_v29, %v1903_v37  ;;  %v1169_v35 = vadd.f32 %v1168_v30, %v1167_v26  ;;  %v1140_v37 = vmax.f32 %v1907_v45, 0.0 }
 0x23b   : > { %v1625_v36 = vpop.eup %1624  ;;  %v840_v38 = vadd.f32 %v839_v32, %v838_v27  ;;  %v1145_v40 = vadd.f32 1.0, %v1623_v33 }
 0x23c   : > { %v1039_v41 = vadd.f32 1.0, %v1625_v36  ;;  %v1170_v42 = vadd.f32 %v1169_v35, %v1064_v34 }
 0x23d   : > { %v948_v46 = vadd.f32 %v947_v39, %v840_v38  ;;  %1626 = vlog2.f32 %v1145_v40 }
 0x23e   : > { %1628 = vlog2.f32 %v1039_v41  ;;  %v1177_v47 = vmul.f32 0.125, %v1170_v42 }
 0x240   : > { %v1185_v48 = vrot.slane %v1177_v47, %v1184_v43 }
 0x242   : > { %v1192_v49 = vrot.slane %v1185_v48, %v1184_v43 }
 0x244   : > { %1193 = vrot.lane.b32.xlu0 %v1192_v49, %s1661_s23 }
 0x247   : > { %v1627_v50 = vpop.eup %1626 }
 0x248   : > { %v1629_v51 = vpop.eup %1628  ;;  %v1147_v53 = vmul.f32 0.6931472, %v1627_v50 }
 0x249   : > { %v1041_v55 = vmul.f32 0.6931472, %v1629_v51 }
 0x24a   : > { %v1148_v56 = vadd.f32 %v1147_v53, %v1140_v37 }
 0x24b   : > { %v1042_v57 = vadd.f32 %v1041_v55, %v1034_v54 }
 0x24c   : > { %v1149_v58 = vmin.f32 %v1148_v56, 100.0 }
 0x24d   : > { %v1043_v59 = vmin.f32 %v1042_v57, 100.0 }
 0x24e   : > { %v1153_v60 = vsel %vm634_vm2, %v1149_v58, 0.0 }
 0x24f   : > { %v1047_v61 = vsel %vm634_vm2, %v1043_v59, 0.0  ;;  %v1155_v62 = vsel %vm833_vm7, %v1153_v60, 0.0 }
 0x250   : > { %v1049_v63 = vsel %vm833_vm7, %v1047_v61, 0.0  ;;  %v1156_v45 = vrot.slane %v1155_v62, 4 }
 0x251   : > { %v1050_v0 = vrot.slane %v1049_v63, 4 }
 0x252   : > { %v1157_v1 = vadd.f32 %v1156_v45, %v1155_v62 }
 0x253   : > { %v1051_v44 = vadd.f32 %v1050_v0, %v1049_v63 }
 0x254   : > { %v1158_v52 = vrot.slane %v1157_v1, 2 }
 0x255   : > { %v1052_v2 = vrot.slane %v1051_v44, 2 }
 0x256   : > { %v1159_v3 = vadd.f32 %v1158_v52, %v1157_v1 }
 0x257   : > { %v1053_v4 = vadd.f32 %v1052_v2, %v1051_v44 }
 0x258   : > { %v1160_v6 = vrot.slane %v1159_v3, 1 }
 0x259   : > { %v1054_v5 = vrot.slane %v1053_v4, 1 }
 0x25a   : > { %v1161_v8 = vadd.f32 %v1160_v6, %v1159_v3 }
 0x25b   : > { %v1055_v7 = vadd.f32 %v1054_v5, %v1053_v4 }
 0x25d   : > { %v1056_v12 = vadd.f32 %v1055_v7, %v948_v46 }
 0x25f   : > { %v1162_v9 = vadd.f32 %v1161_v8, %v1056_v12 }
 0x261   : > { %v1172_v10 = vmul.f32 0.125, %v1162_v9 }
 0x263   : > { %v1173_v11 = vadd.f32 %v1172_v10, %v1171_v19 }
 0x265   : > { %1175 = vst.msk [vmem:[%s1972_s11] sm:$0x1] %vm1174_vm11, %v1173_v11 }
 0x26c   : > { %v1176_v14 = vld [vmem:[%s1972_s11] sm:$0x1] }
 0x2b6   : > { %v1194_v13 = vpop.permute.xlu0 %1193 }
 0x2b7   : > { %v1196_v15 = vadd.f32 %v1194_v13, %v1176_v14 }
 0x2b9   : > { %1198 = vst.msk [vmem:[%s1972_s11] sm:$0x1] %vm1197_vm12, %v1196_v15 }
 0x2ba PF: > { %s23_s21 = sadd.s32 1, %s1652_s21   ;;  %s1973_s19 = smov %s1648_s20 }
 0x2bb   : > { %p20_p6 = scmp.ge.s32.totalorder %s23_s21, 4   ;;  %s1974_s20 = smov %s1976_s10 }
 0x2bd   :  { %22 = sbr.rel (!%p20_p6) target bundleno = 3 (0x3), region = 109 }

</bundles_post_ra>
